<compile_context>
chip_gen: v7x
topology: tpu7x:2x2x1
jax: 0.10.0
libtpu: 0.0.40
codegen_flags: <defaults>
</compile_context>

<pallas_src>
import functools

import jax
import jax.numpy as jnp
from jax.experimental import pallas as pl
from jax.experimental.pallas import tpu as pltpu

# ---- model dimensions (small, consistent with the module) -------------------
N_NODES = 90          # hard-coded in the PyTorch module (classifier2 = hid_dim2 * 90)
DIM_IN = 30           # features0 channel dim
HID1 = 64             # ChebConv out dim; must be 64 to feed fc2 = GraphConvolution(64, hid_dim2)
HID2 = 32             # hid_dim2
OUT_DIM = 18          # out_dim
K_CHEB = 3
SLOPE = 0.2           # LeakyReLU negative slope
NUM_SAMPLES = 4       # size of the stored features0 / adjs bank
BATCH = 2

# ---- padded dims (MXU / vreg friendly) --------------------------------------
N_PAD = 128           # node axis 90 -> 128 (lane dim)
CIN_PAD = 32          # input channels 30 -> 32
OUT_PAD = 32          # classifier output 18 -> 32 (sublane/lane clean, small weight)
JDIM = HID2 * OUT_PAD  # 1024: flattened (channel, out) column axis of the big classifier matmul


# ---------------------------------------------------------------------------
# Fused kernel: ChebConv + LeakyReLU + GraphConvolution + LeakyReLU
#               + classifier (Linear on flattened features) + log_softmax
# Layout: "transposed" node tensors -> (channels, nodes); nodes on lanes.
# Grid: one sample per grid step ("parallel"); batch gather via scalar prefetch.
# ---------------------------------------------------------------------------
def _gcn_fused_kernel(idx_ref,                      # scalar-prefetch (unused in body)
                      adjT_ref, xT_ref, wc_ref, bc_ref, w2T_ref, b2_ref,
                      w3big_ref, sel_ref, fold_ref, b3_ref,
                      featT_ref, logp_ref, *, slope):
    del idx_ref
    f32 = jnp.float32
    bf16 = jnp.bfloat16

    adjT = adjT_ref[0]                       # (N_PAD, N_PAD)   = A^T  (padded), bf16
    xT = xT_ref[0]                           # (CIN_PAD, N_PAD) = x^T  (padded), bf16

    # --- ChebConv (K=3) with T2 folded into the weights:
    #     h = x@(W0-W2) + (Ax)@W1 + (A(Ax))@(2W2) + b
    # wc_ref[0] @ xT can issue immediately (independent of any adjacency matmul).
    hT = jnp.dot(wc_ref[0], xT, preferred_element_type=f32)            # (HID1, N_PAD)
    axT = jnp.dot(xT, adjT, preferred_element_type=f32)                # (Ax)^T
    axT16 = axT.astype(bf16)
    hT = hT + jnp.dot(wc_ref[1], axT16, preferred_element_type=f32)
    a2xT = jnp.dot(axT16, adjT, preferred_element_type=f32)            # (A(Ax))^T
    hT = hT + jnp.dot(wc_ref[2], a2xT.astype(bf16), preferred_element_type=f32)
    hT = hT + bc_ref[...]
    hT = jnp.maximum(hT, slope * hT)                                   # LeakyReLU

    # --- GraphConvolution:  g = A (h W2) + b2 ; transposed: g^T = (W2^T h^T) A^T + b2
    hwT = jnp.dot(w2T_ref[...], hT.astype(bf16), preferred_element_type=f32)  # (HID2, N_PAD)
    gT = jnp.dot(hwT.astype(bf16), adjT, preferred_element_type=f32) + b2_ref[...]
    gT = jnp.maximum(gT, slope * gT)                                   # (HID2, N_PAD)

    featT_ref[0] = gT.astype(featT_ref.dtype)

    # --- Fused classifier (flatten + Linear) + log_softmax, no serialized loop.
    # logits[o] = sum_c sum_n g[n,c] * Wcls[n*HID2 + c, o]
    #   full[c, c'*OUT_PAD + o] = sum_n gT[c, n] * Wcls_pad[n, c', o]        (1 MXU op)
    #   masked = full * SEL   zeroes blocks with c' != c                      (VPU)
    #   part[c, o] = (masked @ FOLD)[c, o] = sum_n g[n,c] * Wcls_pad[n,c,o]   (1 MXU op)
    #   logits = sum_c part + bias                                            (sublane sum)
    # Padded node lanes of gT carry LeakyReLU(b2), but W3big is zero there, so they
    # drop out exactly; padded output lanes get a -1e30 bias -> exp() == 0.
    gT16 = gT.astype(bf16)
    full = jnp.dot(gT16, w3big_ref[...], preferred_element_type=f32)    # (HID2, JDIM)
    masked = full * sel_ref[...]                                        # (HID2, JDIM) f32
    part = jnp.dot(masked, fold_ref[...], preferred_element_type=f32)   # (HID2, OUT_PAD)
    logits = jnp.sum(part, axis=0, keepdims=True) + b3_ref[...]         # (1, OUT_PAD)

    m = jnp.max(logits, axis=-1, keepdims=True)
    sh = logits - m
    lse = jnp.log(jnp.sum(jnp.exp(sh), axis=-1, keepdims=True))
    logp_ref[0] = (sh - lse).astype(logp_ref.dtype)


# ---------------------------------------------------------------------------
# One-time layout prep (hoisted out of the serving path)
# ---------------------------------------------------------------------------
def prepare_banks(features0_bank, adjs_bank):
    """Pad/transpose the stored feature & (normalized) adjacency banks once."""
    bf16 = jnp.bfloat16
    s = features0_bank.shape[0]
    adjT = jnp.swapaxes(adjs_bank, -1, -2).astype(bf16)                    # (S, 90, 90)
    adjT_bank = jnp.zeros((s, N_PAD, N_PAD), bf16).at[:, :N_NODES, :N_NODES].set(adjT)
    xT = jnp.swapaxes(features0_bank, -1, -2).astype(bf16)                 # (S, 30, 90)
    xT_bank = jnp.zeros((s, CIN_PAD, N_PAD), bf16).at[:, :DIM_IN, :N_NODES].set(xT)
    return adjT_bank, xT_bank


def prepare_params(params):
    """One-time weight re-layout: Cheb T2 folding, transposes, padding, classifier
    big-matmul layout + selection/fold matrices."""
    f32, bf16 = jnp.float32, jnp.bfloat16

    # Cheb weights with T2 folded in: W0' = W0 - W2, W1' = W1, W2' = 2*W2
    w0 = params["w_cheb"][0] - params["w_cheb"][2]
    w1 = params["w_cheb"][1]
    w2 = 2.0 * params["w_cheb"][2]
    wc = jnp.stack([w0, w1, w2], axis=0)                                   # (3, 30, 64)
    wc_p = jnp.zeros((K_CHEB, DIM_IN, HID1), f32).at[...].set(wc)
    wc_p = jnp.zeros((K_CHEB, CIN_PAD, HID1), f32).at[:, :DIM_IN, :].set(wc_p)
    wcT = jnp.swapaxes(wc_p, -1, -2).astype(bf16)                          # (3, 64, 32)
    bc = params["b_cheb"].reshape(HID1, 1).astype(f32)                     # (64, 1)

    w2T = params["w_gcn"].T.astype(bf16)                                   # (32, 64)
    b2 = params["b_gcn"].reshape(HID2, 1).astype(f32)                      # (32, 1)

    # Classifier weight (2880, 18) -> W3big[n, c*OUT_PAD + o] = Wcls[n*HID2 + c, o]
    w3 = params["w_cls"].reshape(N_NODES, HID2, OUT_DIM)                   # [n, c, o]
    w3p = jnp.zeros((N_PAD, HID2, OUT_PAD), f32).at[:N_NODES, :, :OUT_DIM].set(w3)
    w3big = w3p.reshape(N_PAD, JDIM).astype(bf16)                          # (128, 1024)

    j = jnp.arange(JDIM)
    sel = (j[None, :] // OUT_PAD == jnp.arange(HID2)[:, None]).astype(f32)    # (32, 1024)
    fold = (j[:, None] % OUT_PAD == jnp.arange(OUT_PAD)[None, :]).astype(f32)  # (1024, 32)

    # Padded output lanes carry a huge negative bias so log_softmax ignores them.
    b3 = jnp.full((1, OUT_PAD), -1e30, f32).at[0, :OUT_DIM].set(
        params["b_cls"].reshape(-1).astype(f32))

    return dict(wcT=wcT, bc=bc, w2T=w2T, b2=b2, w3big=w3big, sel=sel, fold=fold, b3=b3)


# ---------------------------------------------------------------------------
# Forward: scalar-prefetch the batch indices, gather from the banks inside the
# pipeline, run the fused kernel, undo the transposed/padded layout.
# ---------------------------------------------------------------------------
@functools.partial(jax.jit, static_argnums=(4,))
def _gcn_forward_jit(index, adjT_bank, xT_bank, prep, slope):
    b = index.shape[0]

    featT, logp_p = pl.pallas_call(
        functools.partial(_gcn_fused_kernel, slope=slope),
        out_shape=(
            jax.ShapeDtypeStruct((b, HID2, N_PAD), jnp.float32),    # g^T (padded nodes)
            jax.ShapeDtypeStruct((b, 1, OUT_PAD), jnp.float32),     # log-probs (padded)
        ),
        grid_spec=pltpu.PrefetchScalarGridSpec(
            num_scalar_prefetch=1,                                  # `index` -> SMEM
            grid=(b,),
            in_specs=[
                pl.BlockSpec((1, N_PAD, N_PAD),      lambda i, idx: (idx[i], 0, 0)),  # adj^T bank
                pl.BlockSpec((1, CIN_PAD, N_PAD),    lambda i, idx: (idx[i], 0, 0)),  # x^T bank
                pl.BlockSpec((K_CHEB, HID1, CIN_PAD), lambda i, idx: (0, 0, 0)),      # Cheb W^T (folded)
                pl.BlockSpec((HID1, 1),              lambda i, idx: (0, 0)),          # Cheb bias
                pl.BlockSpec((HID2, HID1),           lambda i, idx: (0, 0)),          # GCN W^T
                pl.BlockSpec((HID2, 1),              lambda i, idx: (0, 0)),          # GCN bias
                pl.BlockSpec((N_PAD, JDIM),          lambda i, idx: (0, 0)),          # classifier W (big)
                pl.BlockSpec((HID2, JDIM),           lambda i, idx: (0, 0)),          # SEL mask
                pl.BlockSpec((JDIM, OUT_PAD),        lambda i, idx: (0, 0)),          # FOLD matrix
                pl.BlockSpec((1, OUT_PAD),           lambda i, idx: (0, 0)),          # classifier bias
            ],
            out_specs=[
                pl.BlockSpec((1, HID2, N_PAD), lambda i, idx: (i, 0, 0)),
                pl.BlockSpec((1, 1, OUT_PAD),  lambda i, idx: (i, 0, 0)),
            ],
        ),
        compiler_params=pltpu.CompilerParams(dimension_semantics=("parallel",)),
    )(index, adjT_bank, xT_bank,
      prep["wcT"], prep["bc"], prep["w2T"], prep["b2"],
      prep["w3big"], prep["sel"], prep["fold"], prep["b3"])

    # back to the module's layout: (B, 90, 32) features, (B, 18) log-probs
    feat = jnp.swapaxes(featT, -1, -2)[:, :N_NODES, :]
    logp = logp_p[:, 0, :OUT_DIM]
    return feat, logp


def gcn_forward(index, adjT_bank, xT_bank, prep, slope=SLOPE):
    return _gcn_forward_jit(index, adjT_bank, xT_bank, prep, slope)


# ---------------------------------------------------------------------------
# adj_process: A <- A + I ; binarize ; D^-1/2 A D^-1/2   (preprocessing, plain JAX)
# ---------------------------------------------------------------------------
def adj_process(adjs):
    n = adjs.shape[-1]
    a = adjs + jnp.eye(n, dtype=adjs.dtype)
    a = jnp.where(a > 0.5, 1.0, jnp.where(a < 0.5, 0.0, a))
    deg = jnp.sum(a, axis=-1)
    dinv = jnp.power(deg, -0.5)
    dinv = jnp.where(jnp.isinf(dinv), 0.0, dinv)
    return dinv[..., :, None] * a * dinv[..., None, :]


# ---------------------------------------------------------------------------
# Pure-JAX reference for sanity checking
# ---------------------------------------------------------------------------
def gcn_forward_ref(adj, x, params, slope=SLOPE):
    ax = jnp.einsum("bij,bjc->bic", adj, x)
    t2x = 2.0 * jnp.einsum("bij,bjc->bic", adj, ax) - x
    h = (x @ params["w_cheb"][0] + ax @ params["w_cheb"][1]
         + t2x @ params["w_cheb"][2] + params["b_cheb"])
    h = jnp.where(h >= 0, h, slope * h)
    g = jnp.einsum("bij,bjc->bic", adj, h) @ params["w_gcn"] + params["b_gcn"]
    g = jnp.where(g >= 0, g, slope * g)
    flat = g.reshape(g.shape[0], -1)
    logits = flat @ params["w_cls"] + params["b_cls"]
    logp = jax.nn.log_softmax(logits, axis=1)
    return g, logp


if __name__ == "__main__":
    key = jax.random.PRNGKey(0)
    k_f, k_a, k1, k2, k3, k4, k5, k6 = jax.random.split(key, 8)

    # stored data bank (features0 bank, adjacency bank), then index-select a batch
    features0_bank = jax.random.normal(k_f, (NUM_SAMPLES, N_NODES, DIM_IN), dtype=jnp.float32)
    raw_adj = (jax.random.uniform(k_a, (NUM_SAMPLES, N_NODES, N_NODES)) > 0.85).astype(jnp.float32)
    raw_adj = jnp.maximum(raw_adj, jnp.swapaxes(raw_adj, -1, -2))    # symmetric
    adjs_bank = adj_process(raw_adj)

    index = jnp.array([0, 2], dtype=jnp.int32)   # batch = 2

    # deterministic parameter init (synthetic; not loaded from a checkpoint)
    params = {
        "w_cheb": jax.random.normal(k1, (K_CHEB, DIM_IN, HID1), dtype=jnp.float32) * 0.1,
        "b_cheb": jax.random.normal(k2, (1, HID1), dtype=jnp.float32) * 0.05,
        "w_gcn":  jax.random.normal(k3, (HID1, HID2), dtype=jnp.float32) * 0.1,
        "b_gcn":  jax.random.normal(k4, (1, HID2), dtype=jnp.float32) * 0.05,
        "w_cls":  jax.random.normal(k5, (N_NODES * HID2, OUT_DIM), dtype=jnp.float32) * 0.02,
        "b_cls":  jax.random.normal(k6, (1, OUT_DIM), dtype=jnp.float32) * 0.02,
    }

    # one-time layout prep (off the serving path)
    adjT_bank, xT_bank = prepare_banks(features0_bank, adjs_bank)
    prep = prepare_params(params)
    jax.block_until_ready((adjT_bank, xT_bank, prep))

    feat, logp = gcn_forward(index, adjT_bank, xT_bank, prep)
    jax.block_until_ready((feat, logp))

    # reference on the gathered batch
    x = features0_bank[index]
    adj = adjs_bank[index]
    feat_ref, logp_ref = gcn_forward_ref(adj, x, params)

    assert feat.shape == (BATCH, N_NODES, HID2)
    assert logp.shape == (BATCH, OUT_DIM)
    assert jnp.allclose(feat, feat_ref, atol=5e-2, rtol=5e-2)
    assert jnp.allclose(logp, logp_ref, atol=5e-2, rtol=5e-2)

    print("KERNEL_OK")
</pallas_src>

<mosaic_0001>
module attributes {stable_mosaic.version = 11 : i64} {
  func.func @_gcn_fused_kernel(%arg0: i32, %arg1: memref<2xi32, #tpu.memory_space<smem>>, %arg2: memref<1x128x128xbf16, #tpu.memory_space<vmem>>, %arg3: memref<1x32x128xbf16, #tpu.memory_space<vmem>>, %arg4: memref<3x64x32xbf16, #tpu.memory_space<vmem>>, %arg5: memref<64x1xf32, #tpu.memory_space<vmem>>, %arg6: memref<32x64xbf16, #tpu.memory_space<vmem>>, %arg7: memref<32x1xf32, #tpu.memory_space<vmem>>, %arg8: memref<128x1024xbf16, #tpu.memory_space<vmem>>, %arg9: memref<32x1024xf32, #tpu.memory_space<vmem>>, %arg10: memref<1024x32xf32, #tpu.memory_space<vmem>>, %arg11: memref<1x32xf32, #tpu.memory_space<vmem>>, %arg12: memref<1x32x128xf32, #tpu.memory_space<vmem>>, %arg13: memref<1x1x32xf32, #tpu.memory_space<vmem>>) attributes {dimension_semantics = [#tpu.dimension_semantics<parallel>], iteration_bounds = array<i64: 2>, scalar_prefetch = 1 : i64, scratch_operands = 0 : i64, tpu.core_type = #tpu.core_type<tc>, window_params = [{transform_indices = @transform_0, window_bounds = array<i64: 1, 128, 128>}, {transform_indices = @transform_1, window_bounds = array<i64: 1, 32, 128>}, {pipeline_mode = #tpu.pipeline_mode<synchronous>, transform_indices = @transform_2, window_bounds = array<i64: 3, 64, 32>}, {pipeline_mode = #tpu.pipeline_mode<synchronous>, transform_indices = @transform_3, window_bounds = array<i64: 64, 1>}, {pipeline_mode = #tpu.pipeline_mode<synchronous>, transform_indices = @transform_4, window_bounds = array<i64: 32, 64>}, {pipeline_mode = #tpu.pipeline_mode<synchronous>, transform_indices = @transform_5, window_bounds = array<i64: 32, 1>}, {pipeline_mode = #tpu.pipeline_mode<synchronous>, transform_indices = @transform_6, window_bounds = array<i64: 128, 1024>}, {pipeline_mode = #tpu.pipeline_mode<synchronous>, transform_indices = @transform_7, window_bounds = array<i64: 32, 1024>}, {pipeline_mode = #tpu.pipeline_mode<synchronous>, transform_indices = @transform_8, window_bounds = array<i64: 1024, 32>}, {pipeline_mode = #tpu.pipeline_mode<synchronous>, transform_indices = @transform_9, window_bounds = array<i64: 1, 32>}, {transform_indices = @transform_10, window_bounds = array<i64: 1, 32, 128>}, {transform_indices = @transform_11, window_bounds = array<i64: 1, 1, 32>}]} {
    %c0 = arith.constant 0 : index
    %c0_0 = arith.constant 0 : index
    %c0_1 = arith.constant 0 : index
    %0 = vector.load %arg2[%c0, %c0_0, %c0_1] : memref<1x128x128xbf16, #tpu.memory_space<vmem>>, vector<1x128x128xbf16>
    %1 = vector.shape_cast %0 : vector<1x128x128xbf16> to vector<128x128xbf16>
    %c0_2 = arith.constant 0 : index
    %c0_3 = arith.constant 0 : index
    %c0_4 = arith.constant 0 : index
    %2 = vector.load %arg3[%c0_2, %c0_3, %c0_4] : memref<1x32x128xbf16, #tpu.memory_space<vmem>>, vector<1x32x128xbf16>
    %3 = vector.shape_cast %2 : vector<1x32x128xbf16> to vector<32x128xbf16>
    %c0_5 = arith.constant 0 : index
    %c0_6 = arith.constant 0 : index
    %c0_7 = arith.constant 0 : index
    %4 = vector.load %arg4[%c0_5, %c0_6, %c0_7] : memref<3x64x32xbf16, #tpu.memory_space<vmem>>, vector<1x64x32xbf16>
    %5 = vector.shape_cast %4 : vector<1x64x32xbf16> to vector<64x32xbf16>
    %cst = arith.constant dense<0.000000e+00> : vector<64x128xf32>
    %6 = tpu.matmul %5, %3, %cst {dimension_numbers = #tpu.dot_dimension_numbers<[1], [0], [0], [1], [0, 0, 1, 1], [], []>} : vector<64x32xbf16>, vector<32x128xbf16>, vector<64x128xf32> -> vector<64x128xf32>
    %cst_8 = arith.constant dense<0.000000e+00> : vector<32x128xf32>
    %7 = tpu.matmul %3, %1, %cst_8 {dimension_numbers = #tpu.dot_dimension_numbers<[1], [0], [0], [1], [0, 0, 1, 1], [], []>} : vector<32x128xbf16>, vector<128x128xbf16>, vector<32x128xf32> -> vector<32x128xf32>
    %8 = arith.truncf %7 : vector<32x128xf32> to vector<32x128xbf16>
    %c1 = arith.constant 1 : index
    %c0_9 = arith.constant 0 : index
    %c0_10 = arith.constant 0 : index
    %9 = vector.load %arg4[%c1, %c0_9, %c0_10] : memref<3x64x32xbf16, #tpu.memory_space<vmem>>, vector<1x64x32xbf16>
    %10 = vector.shape_cast %9 : vector<1x64x32xbf16> to vector<64x32xbf16>
    %cst_11 = arith.constant dense<0.000000e+00> : vector<64x128xf32>
    %11 = tpu.matmul %10, %8, %cst_11 {dimension_numbers = #tpu.dot_dimension_numbers<[1], [0], [0], [1], [0, 0, 1, 1], [], []>} : vector<64x32xbf16>, vector<32x128xbf16>, vector<64x128xf32> -> vector<64x128xf32>
    %12 = arith.addf %6, %11 : vector<64x128xf32>
    %cst_12 = arith.constant dense<0.000000e+00> : vector<32x128xf32>
    %13 = tpu.matmul %8, %1, %cst_12 {dimension_numbers = #tpu.dot_dimension_numbers<[1], [0], [0], [1], [0, 0, 1, 1], [], []>} : vector<32x128xbf16>, vector<128x128xbf16>, vector<32x128xf32> -> vector<32x128xf32>
    %c2 = arith.constant 2 : index
    %c0_13 = arith.constant 0 : index
    %c0_14 = arith.constant 0 : index
    %14 = vector.load %arg4[%c2, %c0_13, %c0_14] : memref<3x64x32xbf16, #tpu.memory_space<vmem>>, vector<1x64x32xbf16>
    %15 = vector.shape_cast %14 : vector<1x64x32xbf16> to vector<64x32xbf16>
    %16 = arith.truncf %13 : vector<32x128xf32> to vector<32x128xbf16>
    %cst_15 = arith.constant dense<0.000000e+00> : vector<64x128xf32>
    %17 = tpu.matmul %15, %16, %cst_15 {dimension_numbers = #tpu.dot_dimension_numbers<[1], [0], [0], [1], [0, 0, 1, 1], [], []>} : vector<64x32xbf16>, vector<32x128xbf16>, vector<64x128xf32> -> vector<64x128xf32>
    %18 = arith.addf %12, %17 : vector<64x128xf32>
    %c0_16 = arith.constant 0 : index
    %c0_17 = arith.constant 0 : index
    %19 = vector.load %arg5[%c0_16, %c0_17] : memref<64x1xf32, #tpu.memory_space<vmem>>, vector<64x1xf32>
    %20 = vector.broadcast %19 : vector<64x1xf32> to vector<64x128xf32>
    %21 = arith.addf %18, %20 : vector<64x128xf32>
    %cst_18 = arith.constant 2.000000e-01 : f32
    %22 = vector.broadcast %cst_18 : f32 to vector<64x128xf32>
    %23 = arith.mulf %22, %21 : vector<64x128xf32>
    %24 = arith.maximumf %21, %23 : vector<64x128xf32>
    %c0_19 = arith.constant 0 : index
    %c0_20 = arith.constant 0 : index
    %25 = vector.load %arg6[%c0_19, %c0_20] : memref<32x64xbf16, #tpu.memory_space<vmem>>, vector<32x64xbf16>
    %26 = arith.truncf %24 : vector<64x128xf32> to vector<64x128xbf16>
    %cst_21 = arith.constant dense<0.000000e+00> : vector<32x128xf32>
    %27 = tpu.matmul %25, %26, %cst_21 {dimension_numbers = #tpu.dot_dimension_numbers<[1], [0], [0], [1], [0, 0, 1, 1], [], []>} : vector<32x64xbf16>, vector<64x128xbf16>, vector<32x128xf32> -> vector<32x128xf32>
    %28 = arith.truncf %27 : vector<32x128xf32> to vector<32x128xbf16>
    %cst_22 = arith.constant dense<0.000000e+00> : vector<32x128xf32>
    %29 = tpu.matmul %28, %1, %cst_22 {dimension_numbers = #tpu.dot_dimension_numbers<[1], [0], [0], [1], [0, 0, 1, 1], [], []>} : vector<32x128xbf16>, vector<128x128xbf16>, vector<32x128xf32> -> vector<32x128xf32>
    %c0_23 = arith.constant 0 : index
    %c0_24 = arith.constant 0 : index
    %30 = vector.load %arg7[%c0_23, %c0_24] : memref<32x1xf32, #tpu.memory_space<vmem>>, vector<32x1xf32>
    %31 = vector.broadcast %30 : vector<32x1xf32> to vector<32x128xf32>
    %32 = arith.addf %29, %31 : vector<32x128xf32>
    %cst_25 = arith.constant 2.000000e-01 : f32
    %33 = vector.broadcast %cst_25 : f32 to vector<32x128xf32>
    %34 = arith.mulf %33, %32 : vector<32x128xf32>
    %35 = arith.maximumf %32, %34 : vector<32x128xf32>
    %c0_26 = arith.constant 0 : index
    %c0_27 = arith.constant 0 : index
    %c0_28 = arith.constant 0 : index
    %36 = vector.load %arg12[%c0_26, %c0_27, %c0_28] : memref<1x32x128xf32, #tpu.memory_space<vmem>>, vector<1x32x128xf32>
    %37 = vector.shape_cast %36 : vector<1x32x128xf32> to vector<32x128xf32>
    %38 = vector.shape_cast %35 : vector<32x128xf32> to vector<1x32x128xf32>
    tpu.vector_store %arg12[%c0_26, %c0_27, %c0_28], %38 {strides = array<i32>} : memref<1x32x128xf32, #tpu.memory_space<vmem>>, vector<1x32x128xf32>,
    %39 = arith.truncf %35 : vector<32x128xf32> to vector<32x128xbf16>
    %c0_29 = arith.constant 0 : index
    %c0_30 = arith.constant 0 : index
    %40 = vector.load %arg8[%c0_29, %c0_30] : memref<128x1024xbf16, #tpu.memory_space<vmem>>, vector<128x1024xbf16>
    %cst_31 = arith.constant dense<0.000000e+00> : vector<32x1024xf32>
    %41 = tpu.matmul %39, %40, %cst_31 {dimension_numbers = #tpu.dot_dimension_numbers<[1], [0], [0], [1], [0, 0, 1, 1], [], []>} : vector<32x128xbf16>, vector<128x1024xbf16>, vector<32x1024xf32> -> vector<32x1024xf32>
    %c0_32 = arith.constant 0 : index
    %c0_33 = arith.constant 0 : index
    %42 = vector.load %arg9[%c0_32, %c0_33] : memref<32x1024xf32, #tpu.memory_space<vmem>>, vector<32x1024xf32>
    %43 = arith.mulf %41, %42 : vector<32x1024xf32>
    %c0_34 = arith.constant 0 : index
    %c0_35 = arith.constant 0 : index
    %44 = vector.load %arg10[%c0_34, %c0_35] : memref<1024x32xf32, #tpu.memory_space<vmem>>, vector<1024x32xf32>
    %cst_36 = arith.constant dense<0.000000e+00> : vector<32x32xf32>
    %45 = tpu.matmul %43, %44, %cst_36 {dimension_numbers = #tpu.dot_dimension_numbers<[1], [0], [0], [1], [0, 0, 1, 1], [], []>} : vector<32x1024xf32>, vector<1024x32xf32>, vector<32x32xf32> -> vector<32x32xf32>
    %cst_37 = arith.constant dense<0.000000e+00> : vector<32xf32>
    %46 = vector.multi_reduction <add>, %45, %cst_37 [0] : vector<32x32xf32> to vector<32xf32>
    %47 = vector.shape_cast %46 : vector<32xf32> to vector<1x32xf32>
    %c0_38 = arith.constant 0 : index
    %c0_39 = arith.constant 0 : index
    %48 = vector.load %arg11[%c0_38, %c0_39] : memref<1x32xf32, #tpu.memory_space<vmem>>, vector<1x32xf32>
    %49 = arith.addf %47, %48 : vector<1x32xf32>
    %cst_40 = arith.constant dense<0xFF800000> : vector<1xf32>
    %50 = vector.multi_reduction <maximumf>, %49, %cst_40 [1] : vector<1x32xf32> to vector<1xf32>
    %51 = vector.shape_cast %50 : vector<1xf32> to vector<1x1xf32>
    %52 = vector.broadcast %51 : vector<1x1xf32> to vector<1x32xf32>
    %53 = arith.subf %49, %52 : vector<1x32xf32>
    %54 = math.exp %53 : vector<1x32xf32>
    %cst_41 = arith.constant dense<0.000000e+00> : vector<1xf32>
    %55 = vector.multi_reduction <add>, %54, %cst_41 [1] : vector<1x32xf32> to vector<1xf32>
    %56 = vector.shape_cast %55 : vector<1xf32> to vector<1x1xf32>
    %57 = math.log %56 : vector<1x1xf32>
    %58 = vector.broadcast %57 : vector<1x1xf32> to vector<1x32xf32>
    %59 = arith.subf %53, %58 : vector<1x32xf32>
    %c0_42 = arith.constant 0 : index
    %c0_43 = arith.constant 0 : index
    %c0_44 = arith.constant 0 : index
    %60 = vector.load %arg13[%c0_42, %c0_43, %c0_44] : memref<1x1x32xf32, #tpu.memory_space<vmem>>, vector<1x1x32xf32>
    %61 = vector.shape_cast %60 : vector<1x1x32xf32> to vector<1x32xf32>
    %62 = vector.shape_cast %59 : vector<1x32xf32> to vector<1x1x32xf32>
    tpu.vector_store %arg13[%c0_42, %c0_43, %c0_44], %62 {strides = array<i32>} : memref<1x1x32xf32, #tpu.memory_space<vmem>>, vector<1x1x32xf32>,
    return
  }
  func.func @transform_0(%arg0: i32, %arg1: memref<2xi32, #tpu.memory_space<smem>>) -> (i32, i32, i32) {
    %0 = arith.index_cast %arg0 : i32 to index
    %1 = memref.load %arg1[%0] : memref<2xi32, #tpu.memory_space<smem>>
    %c0_i32 = arith.constant 0 : i32
    %c0_i32_0 = arith.constant 0 : i32
    %c0_i32_1 = arith.constant 0 : i32
    return %1, %c0_i32, %c0_i32_0 : i32, i32, i32
  }
  func.func @transform_1(%arg0: i32, %arg1: memref<2xi32, #tpu.memory_space<smem>>) -> (i32, i32, i32) {
    %0 = arith.index_cast %arg0 : i32 to index
    %1 = memref.load %arg1[%0] : memref<2xi32, #tpu.memory_space<smem>>
    %c0_i32 = arith.constant 0 : i32
    %c0_i32_0 = arith.constant 0 : i32
    %c0_i32_1 = arith.constant 0 : i32
    return %1, %c0_i32, %c0_i32_0 : i32, i32, i32
  }
  func.func @transform_2(%arg0: i32, %arg1: memref<2xi32, #tpu.memory_space<smem>>) -> (i32, i32, i32) {
    %c0_i32 = arith.constant 0 : i32
    %c0_i32_0 = arith.constant 0 : i32
    %c0_i32_1 = arith.constant 0 : i32
    %c0_i32_2 = arith.constant 0 : i32
    return %c0_i32, %c0_i32_0, %c0_i32_1 : i32, i32, i32
  }
  func.func @transform_3(%arg0: i32, %arg1: memref<2xi32, #tpu.memory_space<smem>>) -> (i32, i32) {
    %c0_i32 = arith.constant 0 : i32
    %c0_i32_0 = arith.constant 0 : i32
    %c0_i32_1 = arith.constant 0 : i32
    return %c0_i32, %c0_i32_0 : i32, i32
  }
  func.func @transform_4(%arg0: i32, %arg1: memref<2xi32, #tpu.memory_space<smem>>) -> (i32, i32) {
    %c0_i32 = arith.constant 0 : i32
    %c0_i32_0 = arith.constant 0 : i32
    %c0_i32_1 = arith.constant 0 : i32
    return %c0_i32, %c0_i32_0 : i32, i32
  }
  func.func @transform_5(%arg0: i32, %arg1: memref<2xi32, #tpu.memory_space<smem>>) -> (i32, i32) {
    %c0_i32 = arith.constant 0 : i32
    %c0_i32_0 = arith.constant 0 : i32
    %c0_i32_1 = arith.constant 0 : i32
    return %c0_i32, %c0_i32_0 : i32, i32
  }
  func.func @transform_6(%arg0: i32, %arg1: memref<2xi32, #tpu.memory_space<smem>>) -> (i32, i32) {
    %c0_i32 = arith.constant 0 : i32
    %c0_i32_0 = arith.constant 0 : i32
    %c0_i32_1 = arith.constant 0 : i32
    return %c0_i32, %c0_i32_0 : i32, i32
  }
  func.func @transform_7(%arg0: i32, %arg1: memref<2xi32, #tpu.memory_space<smem>>) -> (i32, i32) {
    %c0_i32 = arith.constant 0 : i32
    %c0_i32_0 = arith.constant 0 : i32
    %c0_i32_1 = arith.constant 0 : i32
    return %c0_i32, %c0_i32_0 : i32, i32
  }
  func.func @transform_8(%arg0: i32, %arg1: memref<2xi32, #tpu.memory_space<smem>>) -> (i32, i32) {
    %c0_i32 = arith.constant 0 : i32
    %c0_i32_0 = arith.constant 0 : i32
    %c0_i32_1 = arith.constant 0 : i32
    return %c0_i32, %c0_i32_0 : i32, i32
  }
  func.func @transform_9(%arg0: i32, %arg1: memref<2xi32, #tpu.memory_space<smem>>) -> (i32, i32) {
    %c0_i32 = arith.constant 0 : i32
    %c0_i32_0 = arith.constant 0 : i32
    %c0_i32_1 = arith.constant 0 : i32
    return %c0_i32, %c0_i32_0 : i32, i32
  }
  func.func @transform_10(%arg0: i32, %arg1: memref<2xi32, #tpu.memory_space<smem>>) -> (i32, i32, i32) {
    %c0_i32 = arith.constant 0 : i32
    %c0_i32_0 = arith.constant 0 : i32
    %c0_i32_1 = arith.constant 0 : i32
    return %arg0, %c0_i32, %c0_i32_0 : i32, i32, i32
  }
  func.func @transform_11(%arg0: i32, %arg1: memref<2xi32, #tpu.memory_space<smem>>) -> (i32, i32, i32) {
    %c0_i32 = arith.constant 0 : i32
    %c0_i32_0 = arith.constant 0 : i32
    %c0_i32_1 = arith.constant 0 : i32
    return %arg0, %c0_i32, %c0_i32_0 : i32, i32, i32
  }
}

</mosaic_0001>

<bundles_post_ra>
// kernel: _gcn_forward_jit.1
= control target key start
LH: loop header
LB: loop body
LE: loop exit
PB: predicated region body
PF: predicated region fallthrough
CT: control target
= control target key end

     0   :  { %s4357_s0 = inlined_call_operand.vmem [shape: s32[2], index: 0, kind: input, shape index: {}]   ;;  %s4358_s1 = inlined_call_operand.vmem [shape: bf16[4,128,128], index: 1, kind: input, shape index: {}]   ;;  %s4359_s2 = inlined_call_operand.vmem [shape: bf16[4,32,128], index: 2, kind: input, shape index: {}]   ;;  %s4360_s3 = inlined_call_operand.vmem [shape: bf16[3,64,32], index: 3, kind: input, shape index: {}]   ;;  %s4361_s4 = inlined_call_operand.vmem [shape: f32[64,1], index: 4, kind: input, shape index: {}]   ;;  %s4362_s5 = inlined_call_operand.vmem [shape: bf16[32,64], index: 5, kind: input, shape index: {}]   ;;  %s4363_s6 = inlined_call_operand.vmem [shape: f32[32,1], index: 6, kind: input, shape index: {}]   ;;  %s4364_s7 = inlined_call_operand.vmem [shape: bf16[128,1024], index: 7, kind: input, shape index: {}]   ;;  %s4365_s8 = inlined_call_operand.vmem [shape: f32[32,1024], index: 8, kind: input, shape index: {}]   ;;  %s4366_s9 = inlined_call_operand.vmem [shape: f32[1024,32], index: 9, kind: input, shape index: {}]   ;;  %s4367_s10 = inlined_call_operand.vmem [shape: f32[1,32], index: 10, kind: input, shape index: {}]   ;;  %s4368_s11 = inlined_call_operand.hbm [shape: f32[2,32,128], index: 11, kind: output, shape index: {0}]   ;;  %s4369_s12 = inlined_call_operand.hbm [shape: f32[2,1,32], index: 12, kind: output, shape index: {1}]  }
   0x1   :  { %4370 = sst [smem:[#allocation11_spill]] %s4358_s1  ;;  %s18_s23 = sshll.u32 %s4357_s0, 4  ;;  %s19_s23 = int_to_ptr.vmem [resolvable:$true] %s18_s23 }
   0x2   :  { %4371 = sst [smem:[#allocation12_spill]] %s4359_s2  ;;  %s3166_s24 = scalar_lea.vmem %s19_s23, 16 }
   0x3   :  { %4372 = sst [smem:[#allocation13_spill]] %s4360_s3  ;;  %p3167_p0 = scmp.ne.s32.totalorder %s19_s23, %s3166_s24 }
   0x4   :  { %4373 = sst [smem:[#allocation14_spill]] %s4361_s4  ;;  %p3171_p1 = scmp.lt.s32.totalorder %s19_s23, %s19_s23 }
   0x5   :  { %p3172_p2 = scmp.lt.s32.totalorder %s3166_s24, %s3166_s24 }
   0x7   :  { %p3173_p3 = por %p3172_p2, %p3171_p1 }
   0x9   :  { %p3174_p4 = pnand %p3173_p3, %p3167_p0 }
   0xb   :  { %3177 = shalt.err (!%p3174_p4)  }
   0xc   :  { %s3276_s25 = smov [#allocation3]  }
   0xd   :  { %21 = dma.vmem_to_smem %s19_s23, 16, %s3276_s25, [#allocation2] }
   0xe   :  { %3250 = dma.done.wait [#allocation2], 16 }
   0xf   :  { %3251 = vsyncadd [#allocation2], 4294967280 }
  0x10   :  { %23 = sfence }
  0x11   :  { %24 = vsyncpa [#allocation5], 0 }
  0x12   :  { %26 = vsyncpa [#allocation5 + $0x1], 0 }
  0x13   :  { %27 = vsyncpa [#allocation7], 0 }
  0x14   :  { %29 = vsyncpa [#allocation7 + $0x1], 0  ;;  %s3350_s26 = smov 0   ;;  %s3352_s0 = smov 0  }
  0x15   :  { %s3354_s27 = smov 0   ;;  %s3356_s28 = smov 0  }
  0x16 LB: > { %s3371_s29 = sadd.s32 4294967295, %s3274_s28   ;;  %s2470_s30 = sadd.s32 4294967294, %s3274_s28   ;;  %s3274_s28 = sphi %s3356_s28, %s4383_s28   ;;  %s3270_s27 = sphi %s3354_s27, %s4382_s27   ;;  %s3266_s0 = sphi %s3352_s0, %s4381_s0   ;;  %s3262_s26 = sphi %s3350_s26, %s4380_s26  }
  0x17   : > { %s3375_s13 = sadd.s32 1, %s3274_s28   ;;  %s266_s14 = sadd.s32 1, %s3270_s27 }
  0x18   : > { %s263_s15 = ssub.s32 %s3274_s28, %s3375_s13  ;;  %p276_p5 = scmp.ne.s32.totalorder %s3270_s27, %s3266_s0 }
  0x19   : > { %p264_p6 = scmp.eq.s32.totalorder %s263_s15, 0  ;;  %p277_p7 = scmp.eq.s32.totalorder %s3371_s29, 1 }
  0x1a   : > { %p282_p8 = scmp.ne.s32.totalorder %s3266_s0, %s3262_s26  ;;  %p283_p9 = scmp.eq.s32.totalorder %s2470_s30, 1 }
  0x1b   : > { %s3386_s16 = scalar_select %p264_p6, %s3270_s27, %s266_s14  }
  0x1c   : > { %p3388_p10 = por %p277_p7, %p276_p5  ;;  %p3392_p11 = por %p283_p9, %p282_p8 }
  0x1d   : > { %p2473_p12 = scmp.ge.s32.totalorder %s3274_s28, 1  ;;  %p371_p13 = scmp.lt.s32.totalorder %s3274_s28, 3 }
  0x1f   : > { %p372_p0 = pnand %p2473_p12, %p371_p13 }
  0x20   : > { %s422_s19 = sld [smem:[#allocation3 + %s3371_s29]] (!%p372_p0)  ;;  %vm605_vm0 = vcmask (!%p372_p0), 261120   ;;  %v3277_v27 = vmov (!%p372_p0), 0   ;;  %v1093_v34 = vld [vmem:[%s4363_s6] sm:$0xff] (!%p372_p0)  ;;  %v1094_v35 = vld [vmem:[%s4363_s6 + $0x8] sm:$0xff] (!%p372_p0)  ;;  %v1095_v36 = vld [vmem:[%s4363_s6 + $0x10] sm:$0xff] (!%p372_p0) }
  0x21   : > { %375 = sbr.rel (%p372_p0) target bundleno = 2080 (0x820), region = 60  ;;  %s429_s20 = sld [smem:[#allocation3 + %s3371_s29]] (!%p372_p0)  ;;  %3136 = vset.pattern.permute.xlu0 (!%p372_p0), %v3277_v27  ;;  %3137 = vset.pattern.permute.xlu1 (!%p372_p0), %v3277_v27  ;;  %v1096_v37 = vld [vmem:[%s4363_s6 + $0x18] sm:$0xff] (!%p372_p0)  ;;  %v3160_v47 = vld [vmem:[%s4362_s5] sm:$0xff] (!%p372_p0)   ;;  %vm1035_vm1 = vcmask (!%p372_p0), 523264   ;;  %vm2323_vm2 = vcmask (!%p372_p0), 253952  }
  0x22   : > { %s4376_s1 = sld [smem:[#allocation11_spill]] (!%p372_p0)  ;;  %s4377_s2 = sld [smem:[#allocation12_spill]] (!%p372_p0) }
  0x23   : > { %s4378_s3 = sld [smem:[#allocation13_spill]] (!%p372_p0)  ;;  %s4379_s4 = sld [smem:[#allocation14_spill]] (!%p372_p0) }
  0x24   : > { %s3675_s23 = sand.u32 (!%p372_p0), 1, %s3266_s0   ;;  %s3278_s22 = smov (!%p372_p0), [#allocation4]  }
  0x26   : > { %p423_p1 = scmp.lt.s32.totalorder (!%p372_p0), %s422_s19, 3 }
  0x27   : > { %p430_p2 = scmp.lt.s32.totalorder (!%p372_p0), %s429_s20, 3 }
  0x28   : > { %s4385_s19 = smov (!%p423_p1, %s422_s19), 3 }
  0x29   : > { %s4387_s20 = smov (!%p430_p2, %s429_s20), 3  ;;  %s2603_s21 = sshll.u32 %s4385_s19, 6  ;;  %v3148_v10 = vld [vmem:[%s4378_s3 + $0x20] sm:$0xff]   ;;  %v3149_v17 = vld [vmem:[%s4378_s3 + $0x28] sm:$0xff]   ;;  %v3150_v18 = vld [vmem:[%s4378_s3 + $0x30] sm:$0xff]  }
  0x2a   : > { %s427_s24 = scalar_lea.vmem %s4376_s1, %s2603_s21  ;;  %s2604_s25 = sshll.u32 %s4387_s20, 4  ;;  %2860 = vmatprep.mubr.msk.bf16.mxu1 %vm605_vm0, %v3148_v10  ;;  %v3151_v19 = vld [vmem:[%s4378_s3 + $0x38] sm:$0xff]   ;;  %v3152_v20 = vld [vmem:[%s4378_s3] sm:$0xff]   ;;  %v3153_v21 = vld [vmem:[%s4378_s3 + $0x8] sm:$0xff]  }
  0x2b   : > { %v3403_v0 = vld [vmem:[%s427_s24] sm:$0xff]   ;;  %v3405_v1 = vld [vmem:[%s427_s24 + $0x8] sm:$0xff]   ;;  %v3410_v2 = vld [vmem:[%s427_s24 + $0x10] sm:$0xff]   ;;  %s434_s15 = scalar_lea.vmem %s4377_s2, %s2604_s25  ;;  %s2605_s19 = sshll.u32 %s3371_s29, 9 }
  0x2c   : > { %2836 = vmatprep.subr.bf16.mxu0 %v3403_v0  ;;  %v3416_v3 = vld [vmem:[%s427_s24 + $0x18] sm:$0xff]   ;;  %v3146_v4 = vld [vmem:[%s434_s15] sm:$0xff]   ;;  %v3425_v6 = vld [vmem:[%s427_s24 + $0x28] sm:$0xff]  }
  0x2d   : > { %2837 = vmatpush3.bf16.msra.mxu0 %v3403_v0  ;;  %2852 = vmatprep.mubr.bf16.mxu0 %v3146_v4  ;;  %v3421_v5 = vld [vmem:[%s427_s24 + $0x20] sm:$0xff]   ;;  %v3429_v7 = vld [vmem:[%s427_s24 + $0x30] sm:$0xff]   ;;  %v3433_v8 = vld [vmem:[%s427_s24 + $0x38] sm:$0xff]   ;;  %s2474_s24 = sshll.u32 %s3675_s23, 5 }
  0x2e   : > { %2838 = vmatprep.subr.bf16.mxu0 %v3405_v1  ;;  %v3147_v9 = vld [vmem:[%s434_s15 + $0x8] sm:$0xff]   ;;  %v3154_v22 = vld [vmem:[%s4378_s3 + $0x10] sm:$0xff]   ;;  %v3155_v23 = vld [vmem:[%s4378_s3 + $0x18] sm:$0xff]   ;;  %s3681_s14 = scalar_lea.vmem [#allocation4], %s2474_s24  ;;  %s3182_s24 = sshll.u32 %s3278_s22, 4  ;;  %s3183_s24 = int_to_ptr.vmem [resolvable:$false] %s3182_s24 }
  0x2f   : > { %v3156_v24 = vld [vmem:[%s4378_s3 + $0x40] sm:$0xff]   ;;  %v947_v26 = vld [vmem:[%s4379_s4 + $0x10] sm:$0xff]  ;;  %v946_v28 = vld [vmem:[%s4379_s4 + $0x8] sm:$0xff]  ;;  %s2355_s1 = sshll.u32 %s3681_s14, 4  ;;  %s4276_s1 = int_to_ptr.vmem [resolvable:$true] %s2355_s1 }
  0x30   : > { %v945_v25 = vld [vmem:[%s4379_s4] sm:$0xff]  ;;  %965 = vperm.xlu1 %3137, %v947_v26   ;;  %v948_v29 = vld [vmem:[%s4379_s4 + $0x18] sm:$0xff]  ;;  %v950_v31 = vld [vmem:[%s4379_s4 + $0x28] sm:$0xff]  ;;  %s3178_s21 = scalar_lea.vmem %s4276_s1, 512  ;;  %p3185_p6 = scmp.lt.s32.totalorder %s4276_s1, %s3183_s24 }
  0x31   : > { %2839 = vmatpush3.bf16.msra.mxu0 %v3405_v1  ;;  %955 = vperm.xlu0 %3136, %v945_v25   ;;  %v949_v30 = vld [vmem:[%s4379_s4 + $0x20] sm:$0xff]  ;;  %v951_v32 = vld [vmem:[%s4379_s4 + $0x30] sm:$0xff]  ;;  %v952_v33 = vld [vmem:[%s4379_s4 + $0x38] sm:$0xff]  ;;  %s2338_s4 = scalar_lea.sflag [#allocation5], %s3675_s23  ;;  %p3179_p3 = scmp.ne.s32.totalorder %s4276_s1, %s3178_s21 }
  0x32   : > { %2840 = vmatprep.subr.bf16.mxu0 %v3410_v2  ;;  %v3157_v44 = vld [vmem:[%s4378_s3 + $0x48] sm:$0xff]   ;;  %v3158_v45 = vld [vmem:[%s4378_s3 + $0x50] sm:$0xff]   ;;  %v3159_v46 = vld [vmem:[%s4378_s3 + $0x58] sm:$0xff]   ;;  %s4282_s3 = scalar_lea.hbm %s4368_s11, %s2605_s19 }
  0x33   : > { %p3180_p4 = pnand %p3179_p3, %p3388_p10 }
  0x34   : > { %970 = vperm.xlu1 %3137, %v948_v29  }
  0x35   : > { %2841 = vmatpush3.bf16.msra.mxu0 %v3410_v2  ;;  %960 = vperm.xlu0 %3136, %v946_v28   ;;  %p3181_p5 = pneg %p3180_p4 }
  0x36   : > { %2842 = vmatprep.subr.bf16.mxu0 %v3416_v3 }
  0x38   : > { %980 = vperm.xlu1 %3137, %v950_v31  }
  0x39   : > { %2843 = vmatpush3.bf16.msra.mxu0 %v3416_v3  ;;  %975 = vperm.xlu0 %3136, %v949_v30  }
  0x3a   : > { %2844 = vmatprep.subr.bf16.mxu0 %v3421_v5 }
  0x3c   : > { %990 = vperm.xlu1 %3137, %v952_v33  }
  0x3d   : > { %2845 = vmatpush3.bf16.msra.mxu0 %v3421_v5  ;;  %985 = vperm.xlu0 %3136, %v951_v32  }
  0x3e   : > { %2846 = vmatprep.subr.bf16.mxu0 %v3425_v6 }
  0x40   : > { %1104 = vperm.xlu1 %3137, %v1094_v35  }
  0x41   : > { %2847 = vmatpush3.bf16.msra.mxu0 %v3425_v6  ;;  %1099 = vperm.xlu0 %3136, %v1093_v34  }
  0x42   : > { %2848 = vmatprep.subr.bf16.mxu0 %v3429_v7 }
  0x44   : > { %1114 = vperm.xlu1 %3137, %v1096_v37   ;;  %v3161_v37 = vld [vmem:[%s4362_s5 + $0x8] sm:$0xff]  }
  0x45   : > { %2849 = vmatpush3.bf16.msra.mxu0 %v3429_v7  ;;  %1109 = vperm.xlu0 %3136, %v1095_v36  }
  0x46   : > { %2850 = vmatprep.subr.bf16.mxu0 %v3433_v8 }
  0x49   : > { %2851 = vmatpush3.bf16.msra.mxu0 %v3433_v8 }
  0x4c   : > { %2853 = vmatmul.mubr.bf16.vlgmr.msra.gmra.mrb[0].mxu0 %v3147_v9 }
  0x4d   : > { %2920 = vmatprep.mubr.msk.bf16.mxu0 %vm1035_vm1, %v3160_v47  ;;  %v1208_v47 = vld [vmem:[%s4364_s7 + $0xe0] sm:$0xff] }
  0xaf   : > { %v966_v49 = vpop.permute.xlu1 %965 }
  0xb0   : > { %v956_v48 = vpop.permute.xlu0 %955 }
  0xb3   : > { %v971_v51 = vpop.permute.xlu1 %970 }
  0xb4   : > { %v961_v50 = vpop.permute.xlu0 %960 }
  0xb7   : > { %v981_v61 = vpop.permute.xlu1 %980 }
  0xb8   : > { %v976_v55 = vpop.permute.xlu0 %975 }
 0x11f   : > { %v2854_v11 = vpop.f32.mrb[0].mxu0 }
 0x120   : > { %v559_v12 = vpop.f32.mrb[1].mxu0 }
 0x121   : > { %v2855_v13 = vpop.f32.mrb[2].mxu0 }
 0x122   : > { %v575_v14 = vpack.c.bf16 %v2855_v13, %v2854_v11  ;;  %v562_v15 = vpop.f32.mrb[3].mxu0 }
 0x123   : > { %v574_v16 = vpack.c.bf16 %v562_v15, %v559_v12  ;;  %v986_v12 = vpop.permute.xlu0 %985 }
 0x125   : > { %2856 = vmatprep.subr.bf16.mxu1 %v574_v16 }
 0x126   : > { %2857 = vmatpush3.bf16.msra.mxu1 %v574_v16 }
 0x127   : > { %2858 = vmatprep.subr.bf16.mxu1 %v575_v14 }
 0x12a   : > { %2859 = vmatpush3.bf16.msra.mxu1 %v575_v14 }
 0x12b   : > { %2868 = vmatprep.subr.bf16.mxu1 %v3146_v4 }
 0x12d   : > { %2861 = vmatmul.mubr.msk.bf16.vlgmr.msra.gmra.mrb[0].mxu1 %vm605_vm0, %v3149_v17 }
 0x12e   : > { %2869 = vmatpush3.bf16.msra.mxu1 %v3146_v4  ;;  %2864 = vmatprep.mubr.msk.bf16.mxu1 %vm605_vm0, %v3150_v18 }
 0x12f   : > { %2870 = vmatprep.subr.bf16.mxu1 %v3147_v9 }
 0x132   : > { %2871 = vmatpush3.bf16.msra.mxu1 %v3147_v9 }
 0x133   : > { %2880 = vmatprep.subr.bf16.mxu1 %v3403_v0 }
 0x135   : > { %2865 = vmatmul.mubr.msk.bf16.gmra.mrb[4].mxu1 %vm605_vm0, %v3151_v19  ;;  %v991_v19 = vpop.permute.xlu1 %990 }
 0x136   : > { %2872 = vmatprep.mubr.msk.bf16.mxu1 %vm605_vm0, %v3152_v20 }
 0x13d   : > { %2873 = vmatmul.mubr.msk.bf16.vlgmr.msra.gmra.mrb[0].mxu1 %vm605_vm0, %v3153_v21 }
 0x13e   : > { %2881 = vmatpush3.bf16.msra.mxu1 %v3403_v0  ;;  %2876 = vmatprep.mubr.msk.bf16.mxu1 %vm605_vm0, %v3154_v22 }
 0x13f   : > { %2882 = vmatprep.subr.bf16.mxu1 %v3405_v1 }
 0x142   : > { %2883 = vmatpush3.bf16.msra.mxu1 %v3405_v1 }
 0x143   : > { %2884 = vmatprep.subr.bf16.mxu1 %v3410_v2 }
 0x145   : > { %2877 = vmatmul.mubr.msk.bf16.gmra.mrb[4].mxu1 %vm605_vm0, %v3155_v23 }
 0x146   : > { %2885 = vmatpush3.bf16.msra.mxu1 %v3410_v2  ;;  %2896 = vmatprep.mubr.bf16.mxu1 %v574_v16 }
 0x147   : > { %2886 = vmatprep.subr.bf16.mxu1 %v3416_v3 }
 0x14a   : > { %2887 = vmatpush3.bf16.msra.mxu1 %v3416_v3 }
 0x14b   : > { %2888 = vmatprep.subr.bf16.mxu1 %v3421_v5 }
 0x14e   : > { %2889 = vmatpush3.bf16.msra.mxu1 %v3421_v5 }
 0x14f   : > { %2890 = vmatprep.subr.bf16.mxu1 %v3425_v6 }
 0x152   : > { %2891 = vmatpush3.bf16.msra.mxu1 %v3425_v6 }
 0x153   : > { %2892 = vmatprep.subr.bf16.mxu1 %v3429_v7 }
 0x156   : > { %2893 = vmatpush3.bf16.msra.mxu1 %v3429_v7 }
 0x157   : > { %2894 = vmatprep.subr.bf16.mxu1 %v3433_v8 }
 0x15a   : > { %2895 = vmatpush3.bf16.msra.mxu1 %v3433_v8 }
 0x15d   : > { %2897 = vmatmul.mubr.bf16.vlgmr.msra.gmra.mrb[8].mxu1 %v575_v14 }
 0x15e   : > { %2904 = vmatprep.mubr.msk.bf16.mxu1 %vm605_vm0, %v3156_v24 }
 0x230   : > { %v2898_v38 = vpop.f32.mrb[8].mxu1 }
 0x231   : > { %v814_v39 = vpop.f32.mrb[9].mxu1 }
 0x232   : > { %v2899_v40 = vpop.f32.mrb[10].mxu1 }
 0x233   : > { %v839_v41 = vpack.c.bf16 %v2899_v40, %v2898_v38  ;;  %v817_v42 = vpop.f32.mrb[11].mxu1 }
 0x234   : > { %v838_v43 = vpack.c.bf16 %v817_v42, %v814_v39  ;;  %v1196_v42 = vld [vmem:[%s4364_s7 + $0x80] sm:$0xff] }
 0x236   : > { %2900 = vmatprep.subr.bf16.mxu1 %v838_v43 }
 0x237   : > { %2901 = vmatpush3.bf16.msra.mxu1 %v838_v43  ;;  %v1200_v43 = vld [vmem:[%s4364_s7 + $0xa0] sm:$0xff] }
 0x238   : > { %2902 = vmatprep.subr.bf16.mxu1 %v839_v41 }
 0x23b   : > { %2903 = vmatpush3.bf16.msra.mxu1 %v839_v41 }
 0x23e   : > { %2905 = vmatmul.mubr.msk.bf16.vlgmr.msra.gmra.mrb[0].mxu1 %vm605_vm0, %v3157_v44  ;;  %v2550_v44 = vcombine.high %v1196_v42, %v1200_v43 }
 0x23f   : > { %2908 = vmatprep.mubr.msk.bf16.mxu1 %vm605_vm0, %v3158_v45  ;;  %v2549_v45 = vcombine.low %v1196_v42, %v1200_v43 }
 0x246   : > { %2909 = vmatmul.mubr.msk.bf16.gmra.mrb[4].mxu1 %vm605_vm0, %v3159_v46  ;;  %v1204_v46 = vld [vmem:[%s4364_s7 + $0xc0] sm:$0xff] }
 0x247   : > { %1596 = vmatprep.mubr.bf16.mxu1 %v3277_v27 }
 0x311   : > { %v2906_v52 = vpop.f32.mrb[0].mxu1 }
 0x312   : > { %v995_v53 = vadd.f32 %v2906_v52, %v966_v49  ;;  %v906_v54 = vpop.f32.mrb[1].mxu1  ;;  %v2557_v49 = vcombine.low %v1204_v46, %v1208_v47 }
 0x313   : > { %v993_v56 = vadd.f32 %v956_v48, %v906_v54  ;;  %v2907_v57 = vpop.f32.mrb[2].mxu1  ;;  %v2558_v48 = vcombine.high %v1204_v46, %v1208_v47  ;;  %v1220_v54 = vld [vmem:[%s4364_s7 + $0x140] sm:$0xff]  ;;  %v1105_v46 = vpop.permute.xlu1 %1104 }
 0x314   : > { %v1003_v58 = vmul.f32 0.2, %v995_v53  ;;  %v996_v59 = vadd.f32 %v2907_v57, %v971_v51  ;;  %v909_v60 = vpop.f32.mrb[3].mxu1  ;;  %v1216_v51 = vld [vmem:[%s4364_s7 + $0x120] sm:$0xff] }
 0x315   : > { %v1001_v62 = vmul.f32 0.2, %v993_v56  ;;  %v994_v63 = vadd.f32 %v961_v50, %v909_v60  ;;  %v1212_v50 = vld [vmem:[%s4364_s7 + $0x100] sm:$0xff] }
 0x316   : > { %v1004_v4 = vmul.f32 0.2, %v996_v59  ;;  %v1011_v10 = vmax.f32 %v995_v53, %v1003_v58  ;;  %v2566_v52 = vcombine.high %v1212_v50, %v1216_v51  ;;  %v2565_v53 = vcombine.low %v1212_v50, %v1216_v51 }
 0x317   : > { %v1002_v9 = vmul.f32 0.2, %v994_v63  ;;  %v1009_v13 = vmax.f32 %v993_v56, %v1001_v62  ;;  %v1193_v62 = vld [vmem:[%s4364_s7 + $0x68] sm:$0xff]  ;;  %v1115_v51 = vpop.permute.xlu1 %1114 }
 0x318   : > { %v1012_v11 = vmax.f32 %v996_v59, %v1004_v4 }
 0x319   : > { %v1010_v14 = vmax.f32 %v994_v63, %v1002_v9  ;;  %v2910_v15 = vpop.f32.mrb[4].mxu1 }
 0x31a   : > { %v999_v16 = vadd.f32 %v2910_v15, %v986_v12  ;;  %v922_v17 = vpop.f32.mrb[5].mxu1  ;;  %v1022_v18 = vpack.c.bf16 %v1012_v11, %v1011_v10  ;;  %v1197_v11 = vld [vmem:[%s4364_s7 + $0x88] sm:$0xff] }
 0x31b   : > { %v997_v20 = vadd.f32 %v976_v55, %v922_v17  ;;  %v2911_v21 = vpop.f32.mrb[6].mxu1  ;;  %v1021_v22 = vpack.c.bf16 %v1010_v14, %v1009_v13  ;;  %v1224_v55 = vld [vmem:[%s4364_s7 + $0x160] sm:$0xff]  ;;  %v1201_v12 = vld [vmem:[%s4364_s7 + $0xa8] sm:$0xff] }
 0x31c   : > { %v1007_v23 = vmul.f32 0.2, %v999_v16  ;;  %v1000_v24 = vadd.f32 %v2911_v21, %v991_v19  ;;  %v925_v25 = vpop.f32.mrb[7].mxu1  ;;  %v2574_v56 = vcombine.high %v1220_v54, %v1224_v55  ;;  %v2573_v57 = vcombine.low %v1220_v54, %v1224_v55  ;;  %v1205_v15 = vld [vmem:[%s4364_s7 + $0xc8] sm:$0xff] }
 0x31d   : > { %v1005_v26 = vmul.f32 0.2, %v997_v20  ;;  %v998_v28 = vadd.f32 %v981_v61, %v925_v25  ;;  %2912 = vmatprep.subr.bf16.mxu0 %v1021_v22  ;;  %v1189_v61 = vld [vmem:[%s4364_s7 + $0x48] sm:$0xff]  ;;  %v2552_v14 = vcombine.high %v1197_v11, %v1201_v12  ;;  %v2551_v17 = vcombine.low %v1197_v11, %v1201_v12  ;;  %v1195_v11 = vld [vmem:[%s4364_s7 + $0x78] sm:$0xff] }
 0x31e   : > { %v1008_v29 = vmul.f32 0.2, %v1000_v24  ;;  %2913 = vmatpush3.bf16.msra.mxu0 %v1021_v22  ;;  %v1015_v31 = vmax.f32 %v999_v16, %v1007_v23  ;;  %v2544_v10 = vcombine.high %v1189_v61, %v1193_v62  ;;  %v2543_v13 = vcombine.low %v1189_v61, %v1193_v62  ;;  %v1209_v16 = vld [vmem:[%s4364_s7 + $0xe8] sm:$0xff] }
 0x31f   : > { %v1006_v30 = vmul.f32 0.2, %v998_v28  ;;  %2914 = vmatprep.subr.bf16.mxu0 %v1022_v18  ;;  %v1013_v33 = vmax.f32 %v997_v20, %v1005_v26  ;;  %v1213_v19 = vld [vmem:[%s4364_s7 + $0x108] sm:$0xff]  ;;  %v2559_v21 = vcombine.low %v1205_v15, %v1209_v16 }
 0x320   : > { %v1016_v32 = vmax.f32 %v1000_v24, %v1008_v29  ;;  %v1217_v20 = vld [vmem:[%s4364_s7 + $0x128] sm:$0xff]  ;;  %v1228_v29 = vld [vmem:[%s4364_s7 + $0x180] sm:$0xff] }
 0x321   : > { %v1014_v34 = vmax.f32 %v998_v28, %v1006_v30  ;;  %v2568_v22 = vcombine.high %v1213_v19, %v1217_v20  ;;  %v1221_v23 = vld [vmem:[%s4364_s7 + $0x148] sm:$0xff]  ;;  %v2567_v25 = vcombine.low %v1213_v19, %v1217_v20  ;;  %v1232_v30 = vld [vmem:[%s4364_s7 + $0x1a0] sm:$0xff]  ;;  %v1199_v19 = vld [vmem:[%s4364_s7 + $0x98] sm:$0xff] }
 0x322   : > { %2915 = vmatpush3.bf16.msra.mxu0 %v1022_v18  ;;  %v1024_v35 = vpack.c.bf16 %v1016_v32, %v1015_v31  ;;  %v2560_v18 = vcombine.high %v1205_v15, %v1209_v16  ;;  %v1225_v24 = vld [vmem:[%s4364_s7 + $0x168] sm:$0xff]  ;;  %v2582_v32 = vcombine.high %v1228_v29, %v1232_v30  ;;  %v1203_v20 = vld [vmem:[%s4364_s7 + $0xb8] sm:$0xff] }
 0x323   : > { %v1023_v36 = vpack.c.bf16 %v1014_v34, %v1013_v33  ;;  %v2576_v26 = vcombine.high %v1221_v23, %v1225_v24  ;;  %v2575_v28 = vcombine.low %v1221_v23, %v1225_v24  ;;  %v1229_v31 = vld [vmem:[%s4364_s7 + $0x188] sm:$0xff]  ;;  %v2581_v34 = vcombine.low %v1228_v29, %v1232_v30  ;;  %v1211_v29 = vld [vmem:[%s4364_s7 + $0xf8] sm:$0xff] }
 0x324   : > { %v1233_v33 = vld [vmem:[%s4364_s7 + $0x1a8] sm:$0xff]  ;;  %v2556_v24 = vcombine.high %v1199_v19, %v1203_v20 }
 0x325   : > { %2916 = vmatprep.subr.bf16.mxu0 %v1023_v36 }
 0x326   : > { %2917 = vmatpush3.bf16.msra.mxu0 %v1023_v36  ;;  %v2584_v36 = vcombine.high %v1229_v31, %v1233_v33 }
 0x327   : > { %2918 = vmatprep.subr.bf16.mxu0 %v1024_v35 }
 0x32a   : > { %2919 = vmatpush3.bf16.msra.mxu0 %v1024_v35  ;;  %v2583_v35 = vcombine.low %v1229_v31, %v1233_v33  ;;  %v2555_v31 = vcombine.low %v1199_v19, %v1203_v20  ;;  %v1891_v19 = vld [vmem:[%s4366_s9 + $0x198] sm:$0xff] }
 0x32b   : > { %2924 = vmatprep.subr.bf16.mxu0 %v3403_v0 }
 0x32d   : > { %2921 = vmatmul.mubr.msk.bf16.vlgmr.msra.gmra.mrb[4].mxu0 %vm1035_vm1, %v3161_v37  ;;  %v1236_v37 = vld [vmem:[%s4364_s7 + $0x1c0] sm:$0xff] }
 0x32e   : > { %2925 = vmatpush3.bf16.msra.mxu0 %v3403_v0  ;;  %v1180_v0 = vld [vmem:[%s4364_s7] sm:$0xff] }
 0x32f   : > { %2926 = vmatprep.subr.bf16.mxu0 %v3405_v1 }
 0x332   : > { %2927 = vmatpush3.bf16.msra.mxu0 %v3405_v1  ;;  %v1184_v1 = vld [vmem:[%s4364_s7 + $0x20] sm:$0xff] }
 0x333   : > { %2928 = vmatprep.subr.bf16.mxu0 %v3410_v2 }
 0x336   : > { %2929 = vmatpush3.bf16.msra.mxu0 %v3410_v2  ;;  %v1181_v2 = vld [vmem:[%s4364_s7 + $0x8] sm:$0xff] }
 0x337   : > { %2930 = vmatprep.subr.bf16.mxu0 %v3416_v3 }
 0x33a   : > { %2931 = vmatpush3.bf16.msra.mxu0 %v3416_v3  ;;  %v2533_v3 = vcombine.low %v1180_v0, %v1184_v1 }
 0x33b   : > { %2932 = vmatprep.subr.bf16.mxu0 %v3421_v5 }
 0x33e   : > { %2933 = vmatpush3.bf16.msra.mxu0 %v3421_v5  ;;  %v2534_v5 = vcombine.high %v1180_v0, %v1184_v1  ;;  %v1240_v0 = vld [vmem:[%s4364_s7 + $0x1e0] sm:$0xff]  ;;  %v1237_v1 = vld [vmem:[%s4364_s7 + $0x1c8] sm:$0xff] }
 0x33f   : > { %2934 = vmatprep.subr.bf16.mxu0 %v3425_v6 }
 0x340   : > { %1564 = vmatprep.subr.bf16.mxu1 %v2534_v5  ;;  %v2589_v5 = vcombine.low %v1236_v37, %v1240_v0 }
 0x341   : > { %1565 = vmatpush1.bf16.msra.mxu1 %v2533_v3  ;;  %v1241_v3 = vld [vmem:[%s4364_s7 + $0x1e8] sm:$0xff] }
 0x342   : > { %2935 = vmatpush3.bf16.msra.mxu0 %v3425_v6  ;;  %v1185_v6 = vld [vmem:[%s4364_s7 + $0x28] sm:$0xff] }
 0x343   : > { %2936 = vmatprep.subr.bf16.mxu0 %v3429_v7  ;;  %v2535_v38 = vcombine.low %v1181_v2, %v1185_v6  ;;  %v2536_v39 = vcombine.high %v1181_v2, %v1185_v6  ;;  %v2590_v2 = vcombine.high %v1236_v37, %v1240_v0  ;;  %v2591_v6 = vcombine.low %v1237_v1, %v1241_v3  ;;  %v1219_v37 = vld [vmem:[%s4364_s7 + $0x138] sm:$0xff] }
 0x346   : > { %2937 = vmatpush3.bf16.msra.mxu0 %v3429_v7  ;;  %v1188_v7 = vld [vmem:[%s4364_s7 + $0x40] sm:$0xff] }
 0x347   : > { %2938 = vmatprep.subr.bf16.mxu0 %v3433_v8 }
 0x34a   : > { %2939 = vmatpush3.bf16.msra.mxu0 %v3433_v8  ;;  %v1192_v8 = vld [vmem:[%s4364_s7 + $0x60] sm:$0xff] }
 0x34b   : > { %v2542_v40 = vcombine.high %v1188_v7, %v1192_v8  ;;  %1617 = vmatprep.subr.bf16.mxu0 %v2536_v39  ;;  %v2541_v41 = vcombine.low %v1188_v7, %v1192_v8  ;;  %v2592_v7 = vcombine.high %v1237_v1, %v1241_v3  ;;  %v1182_v8 = vld [vmem:[%s4364_s7 + $0x10] sm:$0xff]  ;;  %v1183_v39 = vld [vmem:[%s4364_s7 + $0x18] sm:$0xff] }
 0x34d   : > { %1566 = vmatprep.subr.bf16.mxu1 %v2542_v40 }
 0x34e   : > { %1567 = vmatpush1.bf16.msra.mxu1 %v2541_v41  ;;  %v1187_v41 = vld [vmem:[%s4364_s7 + $0x38] sm:$0xff] }
 0x34f   : > { %1568 = vmatprep.subr.bf16.mxu1 %v2550_v44  ;;  %v2539_v43 = vcombine.low %v1183_v39, %v1187_v41  ;;  %v2540_v44 = vcombine.high %v1183_v39, %v1187_v41 }
 0x352   : > { %1569 = vmatpush1.bf16.msra.mxu1 %v2549_v45  ;;  %v1100_v45 = vpop.permute.xlu0 %1099 }
 0x353   : > { %1570 = vmatprep.subr.bf16.mxu1 %v2558_v48 }
 0x356   : > { %1571 = vmatpush1.bf16.msra.mxu1 %v2557_v49  ;;  %v1110_v47 = vpop.permute.xlu0 %1109 }
 0x357   : > { %1572 = vmatprep.subr.bf16.mxu1 %v2566_v52 }
 0x35a   : > { %1573 = vmatpush1.bf16.msra.mxu1 %v2565_v53 }
 0x35b   : > { %1574 = vmatprep.subr.bf16.mxu1 %v2574_v56 }
 0x35e   : > { %1575 = vmatpush1.bf16.msra.mxu1 %v2573_v57 }
 0x35f   : > { %1576 = vmatprep.subr.bf16.mxu1 %v2582_v32 }
 0x362   : > { %1577 = vmatpush1.bf16.msra.mxu1 %v2581_v34  ;;  %v1214_v34 = vld [vmem:[%s4364_s7 + $0x110] sm:$0xff] }
 0x363   : > { %1578 = vmatprep.subr.bf16.mxu1 %v2590_v2 }
 0x366   : > { %1579 = vmatpush1.bf16.msra.mxu1 %v2589_v5  ;;  %v1222_v5 = vld [vmem:[%s4364_s7 + $0x150] sm:$0xff] }
 0x400   : > { %v2922_v58 = vpop.f32.mrb[4].mxu0 }
 0x401   : > { %v1076_v59 = vpop.f32.mrb[5].mxu0 }
 0x402   : > { %v2923_v60 = vpop.f32.mrb[6].mxu0 }
 0x403   : > { %v1092_v63 = vpack.c.bf16 %v2923_v60, %v2922_v58  ;;  %v1079_v4 = vpop.f32.mrb[7].mxu0 }
 0x404   : > { %v1091_v9 = vpack.c.bf16 %v1079_v4, %v1076_v59 }
 0x406   : > { %2940 = vmatprep.mubr.bf16.mxu0 %v1091_v9  ;;  %v1194_v9 = vld [vmem:[%s4364_s7 + $0x70] sm:$0xff] }
 0x407   : > { %2941 = vmatmul.mubr.bf16.vlgmr.msra.gmra.mrb[8].mxu0 %v1092_v63  ;;  %v1190_v63 = vld [vmem:[%s4364_s7 + $0x50] sm:$0xff] }
 0x408   : > { %1618 = vmatpush1.bf16.msra.mxu0 %v2535_v38  ;;  %1649 = vmatprep.mubr.bf16.mxu0 %v3277_v27  ;;  %v1186_v38 = vld [vmem:[%s4364_s7 + $0x30] sm:$0xff]  ;;  %v2546_v15 = vcombine.high %v1190_v63, %v1194_v9 }
 0x409   : > { %1619 = vmatprep.subr.bf16.mxu0 %v2544_v10  ;;  %v2538_v40 = vcombine.high %v1182_v8, %v1186_v38  ;;  %v2537_v42 = vcombine.low %v1182_v8, %v1186_v38  ;;  %v1191_v10 = vld [vmem:[%s4364_s7 + $0x58] sm:$0xff] }
 0x40a   : > { %v2548_v16 = vcombine.high %v1191_v10, %v1195_v11  ;;  %v1227_v8 = vld [vmem:[%s4364_s7 + $0x178] sm:$0xff] }
 0x40b   : > { %1670 = vmatprep.subr.bf16.mxu1 %v2538_v40 }
 0x40c   : > { %1620 = vmatpush1.bf16.msra.mxu0 %v2543_v13 }
 0x40d   : > { %1621 = vmatprep.subr.bf16.mxu0 %v2552_v14 }
 0x410   : > { %1622 = vmatpush1.bf16.msra.mxu0 %v2551_v17  ;;  %v1198_v17 = vld [vmem:[%s4364_s7 + $0x90] sm:$0xff] }
 0x411   : > { %1623 = vmatprep.subr.bf16.mxu0 %v2560_v18  ;;  %v1202_v18 = vld [vmem:[%s4364_s7 + $0xb0] sm:$0xff] }
 0x412   : > { %v2554_v23 = vcombine.high %v1198_v17, %v1202_v18  ;;  %v2553_v30 = vcombine.low %v1198_v17, %v1202_v18  ;;  %v1859_v17 = vld [vmem:[%s4366_s9 + $0x98] sm:$0xff]  ;;  %v1890_v18 = vld [vmem:[%s4366_s9 + $0x190] sm:$0xff] }
 0x414   : > { %1624 = vmatpush1.bf16.msra.mxu0 %v2559_v21  ;;  %v2545_v21 = vcombine.low %v1190_v63, %v1194_v9 }
 0x415   : > { %1625 = vmatprep.subr.bf16.mxu0 %v2568_v22  ;;  %v2547_v22 = vcombine.low %v1191_v10, %v1195_v11  ;;  %v1840_v10 = vld [vmem:[%s4366_s9] sm:$0xff]  ;;  %v1841_v11 = vld [vmem:[%s4366_s9 + $0x8] sm:$0xff] }
 0x416   : > { %v2946_v20 = vpack.c.bf16 %v1841_v11, %v1840_v10  ;;  %v1868_v10 = vld [vmem:[%s4366_s9 + $0xe0] sm:$0xff]  ;;  %v1869_v11 = vld [vmem:[%s4366_s9 + $0xe8] sm:$0xff] }
 0x418   : > { %1626 = vmatpush1.bf16.msra.mxu0 %v2567_v25  ;;  %v1206_v25 = vld [vmem:[%s4364_s7 + $0xd0] sm:$0xff] }
 0x419   : > { %1627 = vmatprep.subr.bf16.mxu0 %v2576_v26  ;;  %v1210_v26 = vld [vmem:[%s4364_s7 + $0xf0] sm:$0xff] }
 0x41a   : > { %v2562_v32 = vcombine.high %v1206_v25, %v1210_v26  ;;  %v2561_v0 = vcombine.low %v1206_v25, %v1210_v26  ;;  %v2980_v25 = vpack.c.bf16 %v1891_v19, %v1890_v18  ;;  %v1874_v26 = vld [vmem:[%s4366_s9 + $0x110] sm:$0xff]  ;;  %v1852_v18 = vld [vmem:[%s4366_s9 + $0x60] sm:$0xff]  ;;  %v2968_v19 = vpack.c.bf16 %v1869_v11, %v1868_v10  ;;  %v1939_v11 = vld [vmem:[%s4366_s9 + $0x318] sm:$0xff] }
 0x41c   : > { %1628 = vmatpush1.bf16.msra.mxu0 %v2575_v28  ;;  %v1207_v28 = vld [vmem:[%s4364_s7 + $0xd8] sm:$0xff] }
 0x41d   : > { %1629 = vmatprep.subr.bf16.mxu0 %v2584_v36  ;;  %v2564_v33 = vcombine.high %v1207_v28, %v1211_v29  ;;  %v1215_v36 = vld [vmem:[%s4364_s7 + $0x118] sm:$0xff]  ;;  %v2563_v1 = vcombine.low %v1207_v28, %v1211_v29  ;;  %v1860_v29 = vld [vmem:[%s4366_s9 + $0xa0] sm:$0xff] }
 0x41e   : > { %v2572_v3 = vcombine.high %v1215_v36, %v1219_v37  ;;  %v2571_v39 = vcombine.low %v1215_v36, %v1219_v37  ;;  %v1875_v28 = vld [vmem:[%s4366_s9 + $0x118] sm:$0xff] }
 0x420   : > { %1630 = vmatpush1.bf16.msra.mxu0 %v2583_v35  ;;  %v1218_v35 = vld [vmem:[%s4364_s7 + $0x130] sm:$0xff] }
 0x421   : > { %1631 = vmatprep.subr.bf16.mxu0 %v2592_v7  ;;  %v2570_v2 = vcombine.high %v1214_v34, %v1218_v35  ;;  %v1223_v7 = vld [vmem:[%s4364_s7 + $0x158] sm:$0xff]  ;;  %v2569_v38 = vcombine.low %v1214_v34, %v1218_v35  ;;  %v1844_v34 = vld [vmem:[%s4366_s9 + $0x20] sm:$0xff]  ;;  %v1845_v35 = vld [vmem:[%s4366_s9 + $0x28] sm:$0xff] }
 0x422   : > { %v2580_v41 = vcombine.high %v1223_v7, %v1227_v8 }
 0x424   : > { %1632 = vmatpush1.bf16.msra.mxu0 %v2591_v6  ;;  %v1226_v6 = vld [vmem:[%s4364_s7 + $0x170] sm:$0xff] }
 0x425   : > { %1723 = vmatprep.subr.bf16.mxu0 %v2540_v44  ;;  %v2578_v40 = vcombine.high %v1222_v5, %v1226_v6  ;;  %v1231_v44 = vld [vmem:[%s4364_s7 + $0x198] sm:$0xff] }
 0x4da   : > { %v2942_v48 = vpop.f32.mrb[8].mxu0 }
 0x4db   : > { %v1160_v49 = vadd.f32 %v2942_v48, %v1110_v47  ;;  %v1151_v50 = vpop.f32.mrb[9].mxu0  ;;  %v2579_v47 = vcombine.low %v1223_v7, %v1227_v8  ;;  %v1846_v8 = vld [vmem:[%s4366_s9 + $0x30] sm:$0xff] }
 0x4dc   : > { %v1152_v52 = vadd.f32 %v1151_v50, %v1100_v45  ;;  %v2943_v53 = vpop.f32.mrb[10].mxu0  ;;  %v1235_v45 = vld [vmem:[%s4364_s7 + $0x1b8] sm:$0xff]  ;;  %v1238_v50 = vld [vmem:[%s4364_s7 + $0x1d0] sm:$0xff] }
 0x4dd   : > { %v1168_v54 = vmul.f32 0.2, %v1160_v49  ;;  %v1163_v55 = vadd.f32 %v2943_v53, %v1115_v51  ;;  %v1154_v56 = vpop.f32.mrb[11].mxu0  ;;  %v1242_v51 = vld [vmem:[%s4364_s7 + $0x1f0] sm:$0xff]  ;;  %v1243_v53 = vld [vmem:[%s4364_s7 + $0x1f8] sm:$0xff] }
 0x4de   : > { %v1166_v57 = vmul.f32 0.2, %v1152_v52  ;;  %v1155_v58 = vadd.f32 %v1154_v56, %v1105_v46  ;;  %v2577_v46 = vcombine.low %v1222_v5, %v1226_v6  ;;  %v2594_v56 = vcombine.high %v1238_v50, %v1242_v51  ;;  %v1895_v5 = vld [vmem:[%s4366_s9 + $0x1b8] sm:$0xff] }
 0x4df   : > { %v1172_v59 = vmax.f32 %v1160_v49, %v1168_v54  ;;  %v1169_v60 = vmul.f32 0.2, %v1163_v55  ;;  %v2588_v49 = vcombine.high %v1231_v44, %v1235_v45  ;;  %v2954_v6 = vpack.c.bf16 %v1845_v35, %v1844_v34  ;;  %v1886_v35 = vld [vmem:[%s4366_s9 + $0x170] sm:$0xff] }
 0x4e0   : > { %v1170_v61 = vmax.f32 %v1152_v52, %v1166_v57  ;;  %v1167_v62 = vmul.f32 0.2, %v1155_v58  ;;  %v1239_v52 = vld [vmem:[%s4364_s7 + $0x1d8] sm:$0xff] }
 0x4e1   : > { %1176 = vst [vmem:[%s3681_s14 + $0x10] sm:$0xff] %v1172_v59  ;;  %v1173_v4 = vmax.f32 %v1163_v55, %v1169_v60  ;;  %v2587_v55 = vcombine.low %v1231_v44, %v1235_v45  ;;  %v2596_v57 = vcombine.high %v1239_v52, %v1243_v53  ;;  %v1888_v60 = vld [vmem:[%s4366_s9 + $0x180] sm:$0xff]  ;;  %v2595_v63 = vcombine.low %v1239_v52, %v1243_v53  ;;  %v1865_v44 = vld [vmem:[%s4366_s9 + $0xc8] sm:$0xff] }
 0x4e2   : > { %1174 = vst [vmem:[%s3681_s14] sm:$0xff] %v1170_v61  ;;  %v1171_v12 = vmax.f32 %v1155_v58, %v1167_v62  ;;  %v1856_v58 = vld [vmem:[%s4366_s9 + $0x80] sm:$0xff]  ;;  %v2593_v62 = vcombine.low %v1238_v50, %v1242_v51  ;;  %v1881_v53 = vld [vmem:[%s4366_s9 + $0x148] sm:$0xff] }
 0x4e3   : > { %1177 = vst [vmem:[%s3681_s14 + $0x18] sm:$0xff] %v1173_v4  ;;  %v3695_v13 = vpack.c.bf16 %v1173_v4, %v1172_v59  ;;  %v1857_v59 = vld [vmem:[%s4366_s9 + $0x88] sm:$0xff]  ;;  %v1896_v45 = vld [vmem:[%s4366_s9 + $0x1c0] sm:$0xff] }
 0x4e4   : > { %1175 = vst [vmem:[%s3681_s14 + $0x8] sm:$0xff] %v1171_v12  ;;  %v3698_v14 = vpack.c.bf16 %v1171_v12, %v1170_v61  ;;  %v1889_v61 = vld [vmem:[%s4366_s9 + $0x188] sm:$0xff]  ;;  %v2944_v4 = vpack.c.bf16 %v1857_v59, %v1856_v58  ;;  %v1872_v12 = vld [vmem:[%s4366_s9 + $0x100] sm:$0xff]  ;;  %s3184_s14 = scalar_lea.vmem %s3183_s24, 1024 }
 0x4e5   : > { %v2976_v9 = vpack.c.bf16 %v1889_v61, %v1888_v60  ;;  %v1880_v52 = vld [vmem:[%s4366_s9 + $0x140] sm:$0xff]  ;;  %v1850_v60 = vld [vmem:[%s4366_s9 + $0x50] sm:$0xff]  ;;  %v1851_v61 = vld [vmem:[%s4366_s9 + $0x58] sm:$0xff]  ;;  %p3186_p7 = scmp.lt.s32.totalorder %s3184_s14, %s3178_s21 }
 0x4e6   : > { %1597 = vmatmul.mubr.bf16.vlgmr.msra.gmra.mrb[12].mxu1 %v3698_v14  ;;  %1650 = vmatmul.mubr.bf16.vlgmr.msra.gmra.mrb[12].mxu0 %v3698_v14  ;;  %v2994_v59 = vpack.c.bf16 %v1881_v53, %v1880_v52 }
 0x4e7   : > { %1671 = vmatpush1.bf16.msra.mxu1 %v2537_v42  ;;  %1724 = vmatpush1.bf16.msra.mxu0 %v2539_v43  ;;  %v1230_v42 = vld [vmem:[%s4364_s7 + $0x190] sm:$0xff]  ;;  %p3187_p8 = por %p3186_p7, %p3185_p6 }
 0x4e8   : > { %1672 = vmatprep.subr.bf16.mxu1 %v2546_v15  ;;  %1725 = vmatprep.subr.bf16.mxu0 %v2548_v16  ;;  %v1234_v43 = vld [vmem:[%s4364_s7 + $0x1b0] sm:$0xff]  ;;  %v1873_v15 = vld [vmem:[%s4366_s9 + $0x108] sm:$0xff] }
 0x4e9   : > { %1606 = vmatprep.mubr.bf16.mxu1 %v3277_v27  ;;  %1659 = vmatprep.mubr.bf16.mxu0 %v3277_v27  ;;  %v2586_v48 = vcombine.high %v1230_v42, %v1234_v43  ;;  %v2585_v54 = vcombine.low %v1230_v42, %v1234_v43  ;;  %v1858_v16 = vld [vmem:[%s4366_s9 + $0x90] sm:$0xff]  ;;  %v1879_v42 = vld [vmem:[%s4366_s9 + $0x138] sm:$0xff]  ;;  %v1864_v43 = vld [vmem:[%s4366_s9 + $0xc0] sm:$0xff]  ;;  %p3188_p9 = pnand %p3187_p8, %p3181_p5 }
 0x4ea   : > { %v2960_v50 = vpack.c.bf16 %v1865_v44, %v1864_v43 }
 0x4eb   : > { %1673 = vmatpush1.bf16.msra.mxu1 %v2545_v21  ;;  %1726 = vmatpush1.bf16.msra.mxu0 %v2547_v22  ;;  %v2978_v21 = vpack.c.bf16 %v1873_v15, %v1872_v12  ;;  %v1842_v22 = vld [vmem:[%s4366_s9 + $0x10] sm:$0xff]  ;;  %v1900_v12 = vld [vmem:[%s4366_s9 + $0x1e0] sm:$0xff]  ;;  %v1901_v15 = vld [vmem:[%s4366_s9 + $0x1e8] sm:$0xff] }
 0x4ec   : > { %1674 = vmatprep.subr.bf16.mxu1 %v2554_v23  ;;  %1727 = vmatprep.subr.bf16.mxu0 %v2556_v24  ;;  %v1843_v23 = vld [vmem:[%s4366_s9 + $0x18] sm:$0xff]  ;;  %v2948_v24 = vpack.c.bf16 %v1859_v17, %v1858_v16  ;;  %v2966_v16 = vpack.c.bf16 %v1851_v61, %v1850_v60  ;;  %v1938_v61 = vld [vmem:[%s4366_s9 + $0x310] sm:$0xff] }
 0x4ed   : > { %v1907_v60 = vld [vmem:[%s4366_s9 + $0x218] sm:$0xff] }
 0x4ee   : > { %1607 = vmatmul.mubr.bf16.gmra.mrb[16].mxu1 %v3695_v13  ;;  %1660 = vmatmul.mubr.bf16.gmra.mrb[16].mxu0 %v3695_v13 }
 0x4ef   : > { %1675 = vmatpush1.bf16.msra.mxu1 %v2553_v30  ;;  %1728 = vmatpush1.bf16.msra.mxu0 %v2555_v31  ;;  %v1861_v30 = vld [vmem:[%s4366_s9 + $0xa8] sm:$0xff]  ;;  %v1892_v31 = vld [vmem:[%s4366_s9 + $0x1a0] sm:$0xff] }
 0x4f0   : > { %1676 = vmatprep.subr.bf16.mxu1 %v2562_v32  ;;  %1729 = vmatprep.subr.bf16.mxu0 %v2564_v33  ;;  %v1893_v32 = vld [vmem:[%s4366_s9 + $0x1a8] sm:$0xff]  ;;  %v2950_v33 = vpack.c.bf16 %v1843_v23, %v1842_v22  ;;  %v2952_v36 = vpack.c.bf16 %v1861_v30, %v1860_v29  ;;  %v1884_v22 = vld [vmem:[%s4366_s9 + $0x160] sm:$0xff]  ;;  %v1902_v29 = vld [vmem:[%s4366_s9 + $0x1f0] sm:$0xff] }
 0x4f1   : > { %1702 = vmatprep.mubr.bf16.mxu1 %v3277_v27  ;;  %1755 = vmatprep.mubr.bf16.mxu0 %v3277_v27  ;;  %v2984_v37 = vpack.c.bf16 %v1893_v32, %v1892_v31  ;;  %v1885_v23 = vld [vmem:[%s4366_s9 + $0x168] sm:$0xff]  ;;  %v1903_v31 = vld [vmem:[%s4366_s9 + $0x1f8] sm:$0xff]  ;;  %v1854_v32 = vld [vmem:[%s4366_s9 + $0x70] sm:$0xff] }
 0x4f3   : > { %1677 = vmatpush1.bf16.msra.mxu1 %v2561_v0  ;;  %1730 = vmatpush1.bf16.msra.mxu0 %v2563_v1  ;;  %v1877_v0 = vld [vmem:[%s4366_s9 + $0x128] sm:$0xff]  ;;  %v1862_v1 = vld [vmem:[%s4366_s9 + $0xb0] sm:$0xff] }
 0x4f4   : > { %1678 = vmatprep.subr.bf16.mxu1 %v2570_v2  ;;  %1731 = vmatprep.subr.bf16.mxu0 %v2572_v3  ;;  %v1863_v2 = vld [vmem:[%s4366_s9 + $0xb8] sm:$0xff]  ;;  %v1894_v3 = vld [vmem:[%s4366_s9 + $0x1b0] sm:$0xff] }
 0x4f7   : > { %1679 = vmatpush1.bf16.msra.mxu1 %v2569_v38  ;;  %1732 = vmatpush1.bf16.msra.mxu0 %v2571_v39  ;;  %v1847_v38 = vld [vmem:[%s4366_s9 + $0x38] sm:$0xff]  ;;  %v2956_v39 = vpack.c.bf16 %v1863_v2, %v1862_v1  ;;  %v1952_v2 = vld [vmem:[%s4366_s9 + $0x380] sm:$0xff] }
 0x4f8   : > { %1680 = vmatprep.subr.bf16.mxu1 %v2578_v40  ;;  %1733 = vmatprep.subr.bf16.mxu0 %v2580_v41  ;;  %v2988_v40 = vpack.c.bf16 %v1895_v5, %v1894_v3  ;;  %v1878_v41 = vld [vmem:[%s4366_s9 + $0x130] sm:$0xff]  ;;  %v1953_v3 = vld [vmem:[%s4366_s9 + $0x388] sm:$0xff] }
 0x4f9   : > { %v3040_v5 = vpack.c.bf16 %v1953_v3, %v1952_v2 }
 0x4fb   : > { %1681 = vmatpush1.bf16.msra.mxu1 %v2577_v46  ;;  %1734 = vmatpush1.bf16.msra.mxu0 %v2579_v47  ;;  %v1897_v46 = vld [vmem:[%s4366_s9 + $0x1c8] sm:$0xff]  ;;  %v2958_v47 = vpack.c.bf16 %v1847_v38, %v1846_v8  ;;  %v1779_v38 = vld [vmem:[%s4365_s8 + $0x18] sm:$0xff] }
 0x4fc   : > { %1682 = vmatprep.subr.bf16.mxu1 %v2586_v48  ;;  %1735 = vmatprep.subr.bf16.mxu0 %v2588_v49  ;;  %v2990_v48 = vpack.c.bf16 %v1879_v42, %v1878_v41  ;;  %v1849_v49 = vld [vmem:[%s4366_s9 + $0x48] sm:$0xff]  ;;  %v2992_v51 = vpack.c.bf16 %v1897_v46, %v1896_v45  ;;  %v1936_v41 = vld [vmem:[%s4366_s9 + $0x300] sm:$0xff]  ;;  %v1922_v46 = vld [vmem:[%s4366_s9 + $0x290] sm:$0xff] }
 0x4fd   : > { %v1777_v8 = vld [vmem:[%s4365_s8 + $0x8] sm:$0xff] }
 0x4fe   : > { %v1937_v42 = vld [vmem:[%s4366_s9 + $0x308] sm:$0xff] }
 0x4ff   : > { %1683 = vmatpush1.bf16.msra.mxu1 %v2585_v54  ;;  %1736 = vmatpush1.bf16.msra.mxu0 %v2587_v55  ;;  %v1866_v54 = vld [vmem:[%s4366_s9 + $0xd0] sm:$0xff]  ;;  %v1867_v55 = vld [vmem:[%s4366_s9 + $0xd8] sm:$0xff]  ;;  %v1785_v45 = vld [vmem:[%s4365_s8 + $0x48] sm:$0xff] }
 0x500   : > { %1684 = vmatprep.subr.bf16.mxu1 %v2594_v56  ;;  %1737 = vmatprep.subr.bf16.mxu0 %v2596_v57  ;;  %v1898_v56 = vld [vmem:[%s4366_s9 + $0x1d0] sm:$0xff]  ;;  %v1899_v57 = vld [vmem:[%s4366_s9 + $0x1d8] sm:$0xff] }
 0x503   : > { %1685 = vmatpush1.bf16.msra.mxu1 %v2593_v62  ;;  %1738 = vmatpush1.bf16.msra.mxu0 %v2595_v63  ;;  %v2964_v62 = vpack.c.bf16 %v1867_v55, %v1866_v54  ;;  %v2996_v63 = vpack.c.bf16 %v1899_v57, %v1898_v56  ;;  %v1784_v55 = vld [vmem:[%s4365_s8 + $0x40] sm:$0xff] }
 0x504   : > { %2945 = vmatprep.subr.bf16.mxu1 %v2944_v4  ;;  %2977 = vmatprep.subr.bf16.mxu0 %v2976_v9  ;;  %v1882_v4 = vld [vmem:[%s4366_s9 + $0x150] sm:$0xff]  ;;  %v1883_v9 = vld [vmem:[%s4366_s9 + $0x158] sm:$0xff] }
 0x505   : > { %v2998_v17 = vpack.c.bf16 %v1883_v9, %v1882_v4 }
 0x506   : > { %1703 = vmatmul.mubr.bf16.vlgmr.msra.gmra.mrb[20].mxu1 %v3698_v14  ;;  %1756 = vmatmul.mubr.bf16.vlgmr.msra.gmra.mrb[20].mxu0 %v3698_v14  ;;  %v2982_v14 = vpack.c.bf16 %v1875_v28, %v1874_v26  ;;  %v1870_v26 = vld [vmem:[%s4366_s9 + $0xf0] sm:$0xff]  ;;  %v1871_v28 = vld [vmem:[%s4366_s9 + $0xf8] sm:$0xff] }
 0x507   : > { %1712 = vmatprep.mubr.bf16.mxu1 %v3277_v27  ;;  %1765 = vmatprep.mubr.bf16.mxu0 %v3277_v27  ;;  %v1876_v27 = vld [vmem:[%s4366_s9 + $0x120] sm:$0xff]  ;;  %v2972_v30 = vpack.c.bf16 %v1871_v28, %v1870_v26  ;;  %v3046_v26 = vpack.c.bf16 %v1939_v11, %v1938_v61 }
 0x508   : > { %2947 = vmatpush3.bf16.msra.mxu1 %v2946_v20  ;;  %2979 = vmatpush3.bf16.msra.mxu0 %v2978_v21  ;;  %v2986_v7 = vpack.c.bf16 %v1877_v0, %v1876_v27  ;;  %v3000_v20 = vpack.c.bf16 %v1901_v15, %v1900_v12  ;;  %v1853_v21 = vld [vmem:[%s4366_s9 + $0x68] sm:$0xff]  ;;  %v1920_v27 = vld [vmem:[%s4366_s9 + $0x280] sm:$0xff] }
 0x509   : > { %2949 = vmatprep.subr.bf16.mxu1 %v2948_v24  ;;  %2981 = vmatprep.subr.bf16.mxu0 %v2980_v25  ;;  %v2970_v24 = vpack.c.bf16 %v1853_v21, %v1852_v18  ;;  %v3002_v25 = vpack.c.bf16 %v1885_v23, %v1884_v22  ;;  %v1921_v0 = vld [vmem:[%s4366_s9 + $0x288] sm:$0xff]  ;;  %v1924_v12 = vld [vmem:[%s4366_s9 + $0x2a0] sm:$0xff]  ;;  %v1794_v23 = vld [vmem:[%s4365_s8 + $0x90] sm:$0xff] }
 0x50a   : > { %v3008_v1 = vpack.c.bf16 %v1921_v0, %v1920_v27  ;;  %v1925_v15 = vld [vmem:[%s4366_s9 + $0x2a8] sm:$0xff]  ;;  %v1792_v22 = vld [vmem:[%s4365_s8 + $0x80] sm:$0xff]  ;;  %v1926_v0 = vld [vmem:[%s4366_s9 + $0x2b0] sm:$0xff] }
 0x50b   : > { %v1957_v21 = vld [vmem:[%s4366_s9 + $0x3a8] sm:$0xff]  ;;  %v3016_v28 = vpack.c.bf16 %v1925_v15, %v1924_v12  ;;  %v1944_v12 = vld [vmem:[%s4366_s9 + $0x340] sm:$0xff] }
 0x50c   : > { %2951 = vmatpush3.bf16.msra.mxu1 %v2950_v33  ;;  %2983 = vmatpush3.bf16.msra.mxu0 %v2982_v14  ;;  %v1855_v33 = vld [vmem:[%s4366_s9 + $0x78] sm:$0xff]  ;;  %v3004_v14 = vpack.c.bf16 %v1903_v31, %v1902_v29  ;;  %v1908_v29 = vld [vmem:[%s4366_s9 + $0x220] sm:$0xff]  ;;  %v1801_v27 = vld [vmem:[%s4365_s8 + $0xc8] sm:$0xff] }
 0x50d   : > { %2953 = vmatprep.subr.bf16.mxu1 %v2952_v36  ;;  %2985 = vmatprep.subr.bf16.mxu0 %v2984_v37  ;;  %v2974_v34 = vpack.c.bf16 %v1855_v33, %v1854_v32  ;;  %v1887_v36 = vld [vmem:[%s4366_s9 + $0x178] sm:$0xff]  ;;  %v1945_v15 = vld [vmem:[%s4366_s9 + $0x348] sm:$0xff] }
 0x50e   : > { %1713 = vmatmul.mubr.bf16.gmra.mrb[24].mxu1 %v3695_v13  ;;  %1766 = vmatmul.mubr.bf16.gmra.mrb[24].mxu0 %v3695_v13  ;;  %v1848_v13 = vld [vmem:[%s4366_s9 + $0x40] sm:$0xff]  ;;  %v3006_v37 = vpack.c.bf16 %v1887_v36, %v1886_v35  ;;  %v1795_v33 = vld [vmem:[%s4365_s8 + $0x98] sm:$0xff]  ;;  %v1941_v35 = vld [vmem:[%s4366_s9 + $0x328] sm:$0xff] }
 0x50f   : > { %v2962_v58 = vpack.c.bf16 %v1849_v49, %v1848_v13  ;;  %v1787_v49 = vld [vmem:[%s4365_s8 + $0x58] sm:$0xff] }
 0x510   : > { %2955 = vmatpush3.bf16.msra.mxu1 %v2954_v6  ;;  %2987 = vmatpush3.bf16.msra.mxu0 %v2986_v7  ;;  %v1776_v6 = vld [vmem:[%s4365_s8] sm:$0xff]  ;;  %v1778_v7 = vld [vmem:[%s4365_s8 + $0x10] sm:$0xff] }
 0x511   : > { %2957 = vmatprep.subr.bf16.mxu1 %v2956_v39  ;;  %2989 = vmatprep.subr.bf16.mxu0 %v2988_v40  ;;  %v1904_v39 = vld [vmem:[%s4366_s9 + $0x200] sm:$0xff]  ;;  %v1905_v40 = vld [vmem:[%s4366_s9 + $0x208] sm:$0xff] }
 0x512   : > { %v3010_v57 = vpack.c.bf16 %v1905_v40, %v1904_v39 }
 0x514   : > { %2959 = vmatpush3.bf16.msra.mxu1 %v2958_v47  ;;  %2991 = vmatpush3.bf16.msra.mxu0 %v2990_v48  ;;  %v1923_v47 = vld [vmem:[%s4366_s9 + $0x298] sm:$0xff] }
 0x515   : > { %2961 = vmatprep.subr.bf16.mxu1 %v2960_v50  ;;  %2993 = vmatprep.subr.bf16.mxu0 %v2992_v51  ;;  %v1954_v50 = vld [vmem:[%s4366_s9 + $0x390] sm:$0xff]  ;;  %v1955_v51 = vld [vmem:[%s4366_s9 + $0x398] sm:$0xff]  ;;  %v3012_v10 = vpack.c.bf16 %v1923_v47, %v1922_v46 }
 0x516   : > { %v1942_v46 = vld [vmem:[%s4366_s9 + $0x330] sm:$0xff] }
 0x518   : > { %2963 = vmatpush3.bf16.msra.mxu1 %v2962_v58  ;;  %2995 = vmatpush3.bf16.msra.mxu0 %v2994_v59  ;;  %v3042_v58 = vpack.c.bf16 %v1937_v42, %v1936_v41  ;;  %v1906_v59 = vld [vmem:[%s4366_s9 + $0x210] sm:$0xff]  ;;  %v1800_v41 = vld [vmem:[%s4365_s8 + $0xc0] sm:$0xff] }
 0x519   : > { %2965 = vmatprep.subr.bf16.mxu1 %v2964_v62  ;;  %2997 = vmatprep.subr.bf16.mxu0 %v2996_v63 }
 0x51c   : > { %2967 = vmatpush3.bf16.msra.mxu1 %v2966_v16  ;;  %2999 = vmatpush3.bf16.msra.mxu0 %v2998_v17  ;;  %v1786_v16 = vld [vmem:[%s4365_s8 + $0x50] sm:$0xff] }
 0x51d   : > { %2969 = vmatprep.subr.bf16.mxu1 %v2968_v19  ;;  %3001 = vmatprep.subr.bf16.mxu0 %v3000_v20  ;;  %v3044_v19 = vpack.c.bf16 %v1955_v51, %v1954_v50  ;;  %v1956_v20 = vld [vmem:[%s4366_s9 + $0x3a0] sm:$0xff]  ;;  %v1943_v51 = vld [vmem:[%s4366_s9 + $0x338] sm:$0xff] }
 0x51e   : > { %v3054_v61 = vpack.c.bf16 %v1943_v51, %v1942_v46  ;;  %v1783_v46 = vld [vmem:[%s4365_s8 + $0x38] sm:$0xff] }
 0x520   : > { %2971 = vmatpush3.bf16.msra.mxu1 %v2970_v24  ;;  %3003 = vmatpush3.bf16.msra.mxu0 %v3002_v25  ;;  %v1793_v24 = vld [vmem:[%s4365_s8 + $0x88] sm:$0xff]  ;;  %v3014_v25 = vpack.c.bf16 %v1907_v60, %v1906_v59 }
 0x521   : > { %2973 = vmatprep.subr.bf16.mxu1 %v2972_v30  ;;  %3005 = vmatprep.subr.bf16.mxu0 %v3004_v14  ;;  %v1909_v30 = vld [vmem:[%s4366_s9 + $0x228] sm:$0xff]  ;;  %v3048_v14 = vpack.c.bf16 %v1957_v21, %v1956_v20  ;;  %v3058_v21 = vpack.c.bf16 %v1945_v15, %v1944_v12  ;;  %v1799_v15 = vld [vmem:[%s4365_s8 + $0xb8] sm:$0xff] }
 0x522   : > { %v1961_v59 = vld [vmem:[%s4366_s9 + $0x3c8] sm:$0xff] }
 0x523   : > { %v1797_v12 = vld [vmem:[%s4365_s8 + $0xa8] sm:$0xff] }
 0x524   : > { %2975 = vmatpush3.bf16.msra.mxu1 %v2974_v34  ;;  %3007 = vmatpush3.bf16.msra.mxu0 %v3006_v37  ;;  %v1940_v34 = vld [vmem:[%s4366_s9 + $0x320] sm:$0xff] }
 0x525   : > { %3009 = vmatprep.subr.bf16.mxu1 %v3008_v1  ;;  %3041 = vmatprep.subr.bf16.mxu0 %v3040_v5  ;;  %v1927_v1 = vld [vmem:[%s4366_s9 + $0x2b8] sm:$0xff] }
 0x526   : > { %v1803_v5 = vld [vmem:[%s4365_s8 + $0xd8] sm:$0xff]  ;;  %v3020_v50 = vpack.c.bf16 %v1927_v1, %v1926_v0  ;;  %v1949_v0 = vld [vmem:[%s4366_s9 + $0x368] sm:$0xff]  ;;  %v1934_v1 = vld [vmem:[%s4366_s9 + $0x2f0] sm:$0xff] }
 0x5b9   : > { %v1598_v43 = vpop.f32.mrb[12].mxu1  ;;  %v1651_v44 = vpop.f32.mrb[12].mxu0 }
 0x5ba   : > { %v1600_v48 = vpop.f32.mrb[13].mxu1  ;;  %v1653_v13 = vpop.f32.mrb[13].mxu0  ;;  %v1808_v62 = vmul.f32 %v1776_v6, %v1598_v43  ;;  %v1810_v63 = vmul.f32 %v1778_v7, %v1651_v44  ;;  %v3018_v6 = vpack.c.bf16 %v1909_v30, %v1908_v29  ;;  %v1958_v7 = vld [vmem:[%s4366_s9 + $0x3b0] sm:$0xff]  ;;  %v3050_v43 = vpack.c.bf16 %v1941_v35, %v1940_v34  ;;  %v1932_v29 = vld [vmem:[%s4366_s9 + $0x2e0] sm:$0xff]  ;;  %v1933_v30 = vld [vmem:[%s4366_s9 + $0x2e8] sm:$0xff] }
 0x5bb   : > { %v1809_v52 = vmul.f32 %v1777_v8, %v1600_v48  ;;  %v1811_v53 = vmul.f32 %v1779_v38, %v1653_v13  ;;  %v1602_v54 = vpop.f32.mrb[14].mxu1  ;;  %v1655_v56 = vpop.f32.mrb[14].mxu0  ;;  %v1959_v8 = vld [vmem:[%s4366_s9 + $0x3b8] sm:$0xff]  ;;  %v1910_v44 = vld [vmem:[%s4366_s9 + $0x230] sm:$0xff]  ;;  %v1916_v34 = vld [vmem:[%s4366_s9 + $0x260] sm:$0xff] }
 0x5bc   : > { %v1604_v4 = vpop.f32.mrb[15].mxu1  ;;  %v1657_v9 = vpop.f32.mrb[15].mxu0  ;;  %v1816_v31 = vmul.f32 %v1784_v55, %v1602_v54  ;;  %v1818_v32 = vmul.f32 %v1786_v16, %v1655_v56  ;;  %v1802_v54 = vld [vmem:[%s4365_s8 + $0xd0] sm:$0xff]  ;;  %v1917_v35 = vld [vmem:[%s4366_s9 + $0x268] sm:$0xff] }
 0x5bd   : > { %v1817_v17 = vmul.f32 %v1785_v45, %v1604_v4  ;;  %v1819_v18 = vmul.f32 %v1787_v49, %v1657_v9  ;;  %2032 = vmatprep.mubr.f32.mxu1 %v1809_v52  ;;  %2117 = vmatprep.mubr.f32.mxu0 %v1811_v53  ;;  %v1911_v45 = vld [vmem:[%s4366_s9 + $0x238] sm:$0xff]  ;;  %v1928_v52 = vld [vmem:[%s4366_s9 + $0x2c0] sm:$0xff]  ;;  %v1929_v53 = vld [vmem:[%s4366_s9 + $0x2c8] sm:$0xff] }
 0x5be   : > { %2033 = vmatmul.mubr.f32.vlgmr.msra.gmra.mrb[28].mxu1 %v1808_v62  ;;  %2118 = vmatmul.mubr.f32.vlgmr.msra.gmra.mrb[28].mxu0 %v1810_v63  ;;  %v3022_v60 = vpack.c.bf16 %v1911_v45, %v1910_v44  ;;  %v3024_v62 = vpack.c.bf16 %v1929_v53, %v1928_v52  ;;  %v1912_v63 = vld [vmem:[%s4366_s9 + $0x240] sm:$0xff]  ;;  %v1913_v4 = vld [vmem:[%s4366_s9 + $0x248] sm:$0xff]  ;;  %v1930_v16 = vld [vmem:[%s4366_s9 + $0x2d0] sm:$0xff] }
 0x5bf   : > { %3011 = vmatpush3.bf16.msra.mxu1 %v3010_v57  ;;  %3043 = vmatpush3.bf16.msra.mxu0 %v3042_v58  ;;  %v3052_v57 = vpack.c.bf16 %v1959_v8, %v1958_v7  ;;  %v1960_v58 = vld [vmem:[%s4366_s9 + $0x3c0] sm:$0xff]  ;;  %v3026_v20 = vpack.c.bf16 %v1913_v4, %v1912_v63  ;;  %v1918_v8 = vld [vmem:[%s4366_s9 + $0x270] sm:$0xff]  ;;  %v1781_v45 = vld [vmem:[%s4365_s8 + $0x28] sm:$0xff] }
 0x5c0   : > { %2037 = vmatprep.mubr.f32.mxu1 %v1817_v17  ;;  %2122 = vmatprep.mubr.f32.mxu0 %v1819_v18  ;;  %v3056_v11 = vpack.c.bf16 %v1961_v59, %v1960_v58  ;;  %v1931_v17 = vld [vmem:[%s4366_s9 + $0x2d8] sm:$0xff]  ;;  %v1962_v18 = vld [vmem:[%s4366_s9 + $0x3d0] sm:$0xff]  ;;  %v1789_v52 = vld [vmem:[%s4365_s8 + $0x68] sm:$0xff] }
 0x5c1   : > { %v1608_v36 = vpop.f32.mrb[16].mxu1  ;;  %v1661_v37 = vpop.f32.mrb[16].mxu0  ;;  %3013 = vmatprep.subr.bf16.mxu1 %v3012_v10  ;;  %3045 = vmatprep.subr.bf16.mxu0 %v3044_v19  ;;  %v1963_v19 = vld [vmem:[%s4366_s9 + $0x3d8] sm:$0xff]  ;;  %v1790_v63 = vld [vmem:[%s4365_s8 + $0x70] sm:$0xff] }
 0x5c2   : > { %v1610_v2 = vpop.f32.mrb[17].mxu1  ;;  %v1663_v3 = vpop.f32.mrb[17].mxu0  ;;  %2038 = vmatmul.mubr.f32.gmra.mrb[30].mxu1 %v1816_v31  ;;  %2123 = vmatmul.mubr.f32.gmra.mrb[30].mxu0 %v1818_v32  ;;  %v1824_v47 = vmul.f32 %v1792_v22, %v1608_v36  ;;  %v1826_v48 = vmul.f32 %v1794_v23, %v1661_v37  ;;  %v1914_v22 = vld [vmem:[%s4366_s9 + $0x250] sm:$0xff]  ;;  %v1915_v23 = vld [vmem:[%s4366_s9 + $0x258] sm:$0xff]  ;;  %v1964_v31 = vld [vmem:[%s4366_s9 + $0x3e0] sm:$0xff]  ;;  %v3032_v36 = vpack.c.bf16 %v1933_v30, %v1932_v29 }
 0x5c3   : > { %v1825_v38 = vmul.f32 %v1793_v24, %v1610_v2  ;;  %v1827_v39 = vmul.f32 %v1795_v33, %v1663_v3  ;;  %3015 = vmatpush3.bf16.msra.mxu1 %v3014_v25  ;;  %3047 = vmatpush3.bf16.msra.mxu0 %v3046_v26  ;;  %v1612_v40 = vpop.f32.mrb[18].mxu1  ;;  %v1665_v42 = vpop.f32.mrb[18].mxu0  ;;  %v3028_v24 = vpack.c.bf16 %v1931_v17, %v1930_v16  ;;  %v1946_v26 = vld [vmem:[%s4366_s9 + $0x350] sm:$0xff]  ;;  %v1965_v32 = vld [vmem:[%s4366_s9 + $0x3e8] sm:$0xff]  ;;  %v1935_v2 = vld [vmem:[%s4366_s9 + $0x2f8] sm:$0xff] }
 0x5c4   : > { %v1614_v13 = vpop.f32.mrb[19].mxu1  ;;  %v1667_v49 = vpop.f32.mrb[19].mxu0  ;;  %3017 = vmatprep.subr.bf16.mxu1 %v3016_v28  ;;  %3049 = vmatprep.subr.bf16.mxu0 %v3048_v14  ;;  %v1832_v9 = vmul.f32 %v1800_v41, %v1612_v40  ;;  %v1834_v10 = vmul.f32 %v1802_v54, %v1665_v42  ;;  %v3060_v25 = vpack.c.bf16 %v1963_v19, %v1962_v18  ;;  %v1947_v28 = vld [vmem:[%s4366_s9 + $0x358] sm:$0xff]  ;;  %v1966_v3 = vld [vmem:[%s4366_s9 + $0x3f0] sm:$0xff]  ;;  %v1796_v17 = vld [vmem:[%s4365_s8 + $0xa0] sm:$0xff] }
 0x5c5   : > { %v1833_v55 = vmul.f32 %v1801_v27, %v1614_v13  ;;  %v1835_v56 = vmul.f32 %v1803_v5, %v1667_v49  ;;  %2042 = vmatprep.mubr.f32.mxu1 %v1825_v38  ;;  %2127 = vmatprep.mubr.f32.mxu0 %v1827_v39  ;;  %v3030_v33 = vpack.c.bf16 %v1915_v23, %v1914_v22  ;;  %v1948_v27 = vld [vmem:[%s4366_s9 + $0x360] sm:$0xff]  ;;  %v1967_v5 = vld [vmem:[%s4366_s9 + $0x3f8] sm:$0xff]  ;;  %v1950_v41 = vld [vmem:[%s4366_s9 + $0x370] sm:$0xff] }
 0x5c6   : > { %2043 = vmatmul.mubr.f32.gmra.mrb[32].mxu1 %v1824_v47  ;;  %2128 = vmatmul.mubr.f32.gmra.mrb[32].mxu0 %v1826_v48  ;;  %v3062_v14 = vpack.c.bf16 %v1947_v28, %v1946_v26  ;;  %v3064_v37 = vpack.c.bf16 %v1965_v32, %v1964_v31  ;;  %v3066_v7 = vpack.c.bf16 %v1949_v0, %v1948_v27  ;;  %v1919_v40 = vld [vmem:[%s4366_s9 + $0x278] sm:$0xff]  ;;  %v1780_v48 = vld [vmem:[%s4365_s8 + $0x20] sm:$0xff]  ;;  %v1782_v49 = vld [vmem:[%s4365_s8 + $0x30] sm:$0xff] }
 0x5c7   : > { %3019 = vmatpush3.bf16.msra.mxu1 %v3018_v6  ;;  %3051 = vmatpush3.bf16.msra.mxu0 %v3050_v43  ;;  %v3034_v6 = vpack.c.bf16 %v1917_v35, %v1916_v34  ;;  %v3036_v38 = vpack.c.bf16 %v1935_v2, %v1934_v1  ;;  %v3068_v39 = vpack.c.bf16 %v1967_v5, %v1966_v3  ;;  %v1951_v42 = vld [vmem:[%s4366_s9 + $0x378] sm:$0xff]  ;;  %v1798_v19 = vld [vmem:[%s4365_s8 + $0xb0] sm:$0xff]  ;;  %v1805_v22 = vld [vmem:[%s4365_s8 + $0xe8] sm:$0xff] }
 0x5c8   : > { %2047 = vmatprep.mubr.f32.mxu1 %v1833_v55  ;;  %2132 = vmatprep.mubr.f32.mxu0 %v1835_v56  ;;  %v3038_v43 = vpack.c.bf16 %v1919_v40, %v1918_v8  ;;  %v3070_v44 = vpack.c.bf16 %v1951_v42, %v1950_v41  ;;  %v1791_v53 = vld [vmem:[%s4365_s8 + $0x78] sm:$0xff] }
 0x5c9   : > { %3021 = vmatprep.subr.bf16.mxu1 %v3020_v50  ;;  %3053 = vmatprep.subr.bf16.mxu0 %v3052_v57  ;;  %v1807_v23 = vld [vmem:[%s4365_s8 + $0xf8] sm:$0xff] }
 0x5ca   : > { %2048 = vmatmul.mubr.f32.gmra.mrb[34].mxu1 %v1832_v9  ;;  %2133 = vmatmul.mubr.f32.gmra.mrb[34].mxu0 %v1834_v10 }
 0x5cb   : > { %3023 = vmatpush3.bf16.msra.mxu1 %v3022_v60  ;;  %3055 = vmatpush3.bf16.msra.mxu0 %v3054_v61 }
 0x5cc   : > { %3025 = vmatprep.subr.bf16.mxu1 %v3024_v62  ;;  %3057 = vmatprep.subr.bf16.mxu0 %v3056_v11  ;;  %v1788_v62 = vld [vmem:[%s4365_s8 + $0x60] sm:$0xff] }
 0x5cf   : > { %3027 = vmatpush3.bf16.msra.mxu1 %v3026_v20  ;;  %3059 = vmatpush3.bf16.msra.mxu0 %v3058_v21 }
 0x5d0   : > { %3029 = vmatprep.subr.bf16.mxu1 %v3028_v24  ;;  %3061 = vmatprep.subr.bf16.mxu0 %v3060_v25 }
 0x5d3   : > { %3031 = vmatpush3.bf16.msra.mxu1 %v3030_v33  ;;  %3063 = vmatpush3.bf16.msra.mxu0 %v3062_v14  ;;  %v1804_v33 = vld [vmem:[%s4365_s8 + $0xe0] sm:$0xff]  ;;  %v1806_v14 = vld [vmem:[%s4365_s8 + $0xf0] sm:$0xff] }
 0x5d4   : > { %3033 = vmatprep.subr.bf16.mxu1 %v3032_v36  ;;  %3065 = vmatprep.subr.bf16.mxu0 %v3064_v37 }
 0x5d7   : > { %3035 = vmatpush3.bf16.msra.mxu1 %v3034_v6  ;;  %3067 = vmatpush3.bf16.msra.mxu0 %v3066_v7 }
 0x5d8   : > { %3037 = vmatprep.subr.bf16.mxu1 %v3036_v38  ;;  %3069 = vmatprep.subr.bf16.mxu0 %v3068_v39 }
 0x5d9   : > { %v1704_v47 = vpop.f32.mrb[20].mxu1  ;;  %v1757_v13 = vpop.f32.mrb[20].mxu0 }
 0x5da   : > { %v1706_v50 = vpop.f32.mrb[21].mxu1  ;;  %v1759_v51 = vpop.f32.mrb[21].mxu0  ;;  %v1812_v58 = vmul.f32 %v1780_v48, %v1704_v47  ;;  %v1814_v59 = vmul.f32 %v1782_v49, %v1757_v13 }
 0x5db   : > { %v1813_v54 = vmul.f32 %v1781_v45, %v1706_v50  ;;  %v1815_v55 = vmul.f32 %v1783_v46, %v1759_v51  ;;  %v1708_v56 = vpop.f32.mrb[22].mxu1  ;;  %v1761_v57 = vpop.f32.mrb[22].mxu0  ;;  %3039 = vmatpush3.bf16.msra.mxu1 %v3038_v43  ;;  %3071 = vmatpush3.bf16.msra.mxu0 %v3070_v44 }
 0x5dc   : > { %v1710_v60 = vpop.f32.mrb[23].mxu1  ;;  %v1763_v61 = vpop.f32.mrb[23].mxu0  ;;  %v1820_v10 = vmul.f32 %v1788_v62, %v1708_v56  ;;  %v1822_v11 = vmul.f32 %v1790_v63, %v1761_v57 }
 0x5dd   : > { %v1821_v4 = vmul.f32 %v1789_v52, %v1710_v60  ;;  %v1823_v9 = vmul.f32 %v1791_v53, %v1763_v61  ;;  %2202 = vmatprep.mubr.f32.mxu1 %v1813_v54  ;;  %2287 = vmatprep.mubr.f32.mxu0 %v1815_v55 }
 0x5de   : > { %2203 = vmatmul.mubr.f32.vlgmr.msra.gmra.mrb[36].mxu1 %v1812_v58  ;;  %2288 = vmatmul.mubr.f32.vlgmr.msra.gmra.mrb[36].mxu0 %v1814_v59 }
 0x5df   : > { %2207 = vmatprep.mubr.f32.mxu1 %v1821_v4  ;;  %2292 = vmatprep.mubr.f32.mxu0 %v1823_v9 }
 0x5e1   : > { %v1714_v16 = vpop.f32.mrb[24].mxu1  ;;  %v1767_v18 = vpop.f32.mrb[24].mxu0 }
 0x5e2   : > { %v1716_v20 = vpop.f32.mrb[25].mxu1  ;;  %v1769_v21 = vpop.f32.mrb[25].mxu0  ;;  %2208 = vmatmul.mubr.f32.gmra.mrb[38].mxu1 %v1820_v10  ;;  %2293 = vmatmul.mubr.f32.gmra.mrb[38].mxu0 %v1822_v11  ;;  %v1828_v29 = vmul.f32 %v1796_v17, %v1714_v16  ;;  %v1830_v30 = vmul.f32 %v1798_v19, %v1767_v18 }
 0x5e3   : > { %v1829_v24 = vmul.f32 %v1797_v12, %v1716_v20  ;;  %v1831_v25 = vmul.f32 %v1799_v15, %v1769_v21  ;;  %v1718_v26 = vpop.f32.mrb[26].mxu1  ;;  %v1771_v28 = vpop.f32.mrb[26].mxu0 }
 0x5e4   : > { %v1720_v31 = vpop.f32.mrb[27].mxu1  ;;  %v1773_v32 = vpop.f32.mrb[27].mxu0  ;;  %v1836_v36 = vmul.f32 %v1804_v33, %v1718_v26  ;;  %v1838_v37 = vmul.f32 %v1806_v14, %v1771_v28 }
 0x5e5   : > { %v1837_v34 = vmul.f32 %v1805_v22, %v1720_v31  ;;  %v1839_v35 = vmul.f32 %v1807_v23, %v1773_v32  ;;  %2212 = vmatprep.mubr.f32.mxu1 %v1829_v24  ;;  %2297 = vmatprep.mubr.f32.mxu0 %v1831_v25 }
 0x5e6   : > { %2213 = vmatmul.mubr.f32.gmra.mrb[40].mxu1 %v1828_v29  ;;  %2298 = vmatmul.mubr.f32.gmra.mrb[40].mxu0 %v1830_v30 }
 0x5e7   : > { %2217 = vmatprep.mubr.f32.mxu1 %v1837_v34  ;;  %2302 = vmatprep.mubr.f32.mxu0 %v1839_v35 }
 0x5ea   : > { %2218 = vmatmul.mubr.f32.gmra.mrb[42].mxu1 %v1836_v36  ;;  %2303 = vmatmul.mubr.f32.gmra.mrb[42].mxu0 %v1838_v37 }
 0x691   : > { %v2692_v27 = vpop.f32.mrb[28].mxu1  ;;  %v2736_v0 = vpop.f32.mrb[28].mxu0 }
 0x692   : > { %v2693_v1 = vpop.f32.mrb[29].mxu1  ;;  %v2737_v2 = vpop.f32.mrb[29].mxu0 }
 0x693   : > { %v2694_v3 = vadd.f32 %v2693_v1, %v2692_v27  ;;  %v2738_v5 = vadd.f32 %v2737_v2, %v2736_v0 }
 0x695   : > { %v2120_v6 = vadd.f32 %v2738_v5, %v2694_v3  ;;  %v2695_v7 = vpop.f32.mrb[30].mxu1  ;;  %v2739_v8 = vpop.f32.mrb[30].mxu0 }
 0x696   : > { %v2696_v38 = vpop.f32.mrb[31].mxu1  ;;  %v2740_v39 = vpop.f32.mrb[31].mxu0 }
 0x697   : > { %v2697_v40 = vadd.f32 %v2696_v38, %v2695_v7  ;;  %v2741_v41 = vadd.f32 %v2740_v39, %v2739_v8  ;;  %v2321_v8 = vld [vmem:[%s4367_s10] sm:$0x1] }
 0x699   : > { %v2125_v42 = vadd.f32 %v2741_v41, %v2697_v40  ;;  %v2698_v43 = vpop.f32.mrb[32].mxu1  ;;  %v2742_v44 = vpop.f32.mrb[32].mxu0 }
 0x69a   : > { %v2699_v45 = vpop.f32.mrb[33].mxu1  ;;  %v2743_v46 = vpop.f32.mrb[33].mxu0 }
 0x69b   : > { %v2700_v47 = vadd.f32 %v2699_v45, %v2698_v43  ;;  %v2744_v48 = vadd.f32 %v2743_v46, %v2742_v44 }
 0x69d   : > { %v2130_v13 = vadd.f32 %v2744_v48, %v2700_v47  ;;  %v2701_v49 = vpop.f32.mrb[34].mxu1  ;;  %v2745_v50 = vpop.f32.mrb[34].mxu0 }
 0x69e   : > { %v2702_v51 = vpop.f32.mrb[35].mxu1  ;;  %v2746_v52 = vpop.f32.mrb[35].mxu0 }
 0x69f   : > { %v2703_v53 = vadd.f32 %v2702_v51, %v2701_v49  ;;  %v2747_v54 = vadd.f32 %v2746_v52, %v2745_v50 }
 0x6a1   : > { %v2135_v55 = vadd.f32 %v2747_v54, %v2703_v53 }
 0x6b1   : > { %v2780_v56 = vpop.f32.mrb[36].mxu1  ;;  %v2824_v57 = vpop.f32.mrb[36].mxu0 }
 0x6b2   : > { %v2781_v58 = vpop.f32.mrb[37].mxu1  ;;  %v2825_v59 = vpop.f32.mrb[37].mxu0 }
 0x6b3   : > { %v2782_v60 = vadd.f32 %v2781_v58, %v2780_v56  ;;  %v2826_v61 = vadd.f32 %v2825_v59, %v2824_v57 }
 0x6b5   : > { %v2205_v62 = vadd.f32 %v2782_v60, %v2120_v6  ;;  %v2783_v63 = vpop.f32.mrb[38].mxu1  ;;  %v2827_v4 = vpop.f32.mrb[38].mxu0 }
 0x6b6   : > { %v2784_v9 = vpop.f32.mrb[39].mxu1  ;;  %v2828_v10 = vpop.f32.mrb[39].mxu0 }
 0x6b7   : > { %v2290_v11 = vadd.f32 %v2826_v61, %v2205_v62  ;;  %v2785_v12 = vadd.f32 %v2784_v9, %v2783_v63  ;;  %v2829_v15 = vadd.f32 %v2828_v10, %v2827_v4 }
 0x6b9   : > { %v2210_v16 = vadd.f32 %v2785_v12, %v2125_v42  ;;  %v2786_v17 = vpop.f32.mrb[40].mxu1  ;;  %v2830_v18 = vpop.f32.mrb[40].mxu0  ;;  %v2308_v24 = vsel %vm605_vm0, %v2290_v11, 0.0 }
 0x6ba   : > { %v2787_v19 = vpop.f32.mrb[41].mxu1  ;;  %v2831_v20 = vpop.f32.mrb[41].mxu0 }
 0x6bb   : > { %v2295_v21 = vadd.f32 %v2829_v15, %v2210_v16  ;;  %v2788_v22 = vadd.f32 %v2787_v19, %v2786_v17  ;;  %v2832_v23 = vadd.f32 %v2831_v20, %v2830_v18 }
 0x6bd   : > { %v2309_v25 = vsel %vm605_vm0, %v2295_v21, 0.0  ;;  %v2215_v26 = vadd.f32 %v2788_v22, %v2130_v13  ;;  %v2789_v28 = vpop.f32.mrb[42].mxu1  ;;  %v2833_v29 = vpop.f32.mrb[42].mxu0 }
 0x6be   : > { %v2310_v30 = vadd.f32 %v2309_v25, %v2308_v24  ;;  %v2790_v31 = vpop.f32.mrb[43].mxu1  ;;  %v2834_v32 = vpop.f32.mrb[43].mxu0 }
 0x6bf   : > { %v2300_v33 = vadd.f32 %v2832_v23, %v2215_v26  ;;  %v2791_v14 = vadd.f32 %v2790_v31, %v2789_v28  ;;  %v2835_v34 = vadd.f32 %v2834_v32, %v2833_v29 }
 0x6c1   : > { %v2311_v35 = vsel %vm605_vm0, %v2300_v33, 0.0  ;;  %v2220_v36 = vadd.f32 %v2791_v14, %v2135_v55 }
 0x6c2   : > { %v2312_v37 = vadd.f32 %v2311_v35, %v2310_v30 }
 0x6c3   : > { %v2305_v27 = vadd.f32 %v2835_v34, %v2220_v36 }
 0x6c5   : > { %v2313_v0 = vsel %vm605_vm0, %v2305_v27, 0.0 }
 0x6c6   : > { %v2314_v1 = vadd.f32 %v2313_v0, %v2312_v37 }
 0x6c8   : > { %v2315_v2 = vrot.slane %v2314_v1, 4 }
 0x6ca   : > { %v2316_v3 = vadd.f32 %v2315_v2, %v2314_v1 }
 0x6cc   : > { %v2317_v5 = vrot.slane %v2316_v3, 2 }
 0x6ce   : > { %v2318_v6 = vadd.f32 %v2317_v5, %v2316_v3 }
 0x6d0   : > { %v2319_v7 = vrot.slane %v2318_v6, 1 }
 0x6d2   : > { %v2320_v38 = vadd.f32 %v2319_v7, %v2318_v6 }
 0x6d4   : > { %v2322_v39 = vadd.f32 %v2321_v8, %v2320_v38 }
 0x6d6   : > { %v2324_v40 = vsel %vm2323_vm2, %v2322_v39, -inf }
 0x6d7   : > { %2325 = vmax.xlane.f32.xlu0 %v2324_v40 }
 0x764   : > { %v2326_v41 = vpop.xlane.xlu0 %2325 }
 0x765   : > { %v2327_v42 = vsub.f32 %v2322_v39, %v2326_v41 }
 0x767   : > { %v2328_v43 = vmul.f32 1.442695, %v2327_v42 }
 0x769   : > { %3162 = vpow2.f32 %v2328_v43 }
 0x773   : > { %v3163_v44 = vpop.eup %3162 }
 0x774   : > { %v2330_v45 = vsel %vm2323_vm2, %v3163_v44, 0.0 }
 0x775   : > { %2331 = vadd.xlane.f32.xlu1 %v2330_v45 }
 0x776   : > { %3191 = shalt.err (!%p3188_p9)
}
 0x777   : > { %s3192_s25 = scalar_lea.hbm %s4282_s3, 512  ;;  %s3196_s19 = scalar_lea.hbm %s4368_s11, 1024 }
 0x778   : > { %p3193_p12 = scmp.ne.s32.totalorder %s4282_s3, %s3192_s25  ;;  %p3197_p1 = scmp.lt.u32.totalorder %s4282_s3, %s4368_s11 }
 0x779   : > { %p3198_p2 = scmp.lt.u32.totalorder %s3196_s19, %s3192_s25  ;;  %p3200_p4 = scmp.lt.u32.totalorder %s3192_s25, %s4282_s3 }
 0x77a   : > { %p3194_p13 = pnand %p3193_p12, %p3388_p10 }
 0x77b   : > { %p3199_p3 = por %p3198_p2, %p3197_p1 }
 0x77c   : > { %p3195_p0 = pneg %p3194_p13 }
 0x77d   : > { %p3201_p5 = por %p3200_p4, %p3199_p3 }
 0x77f   : > { %p3202_p6 = pnand %p3201_p5, %p3195_p0 }
 0x781   : > { %3205 = shalt.err (!%p3202_p6)
}
 0x782   : > { %s3279_s21 = smov 128   ;;  %s3280_s22 = smov 8  }
 0x783   : > { %3088 = dma.vmem_to_hbm [thread:$0]  (%p3388_p10), %s4276_s1, 512, %s4282_s3, %s2338_s4, %s3279_s21, %s3279_s21, %s3280_s22  }
 0x784   : > { %s2600_s24 = sshll.u32 %s3371_s29, 4  ;;  %s421_s14 = scalar_lea.vmem [#allocation6], %s3675_s23 }
 0x785   : > { %s2371_s25 = sshll.u32 %s421_s14, 4  ;;  %s4313_s19 = scalar_lea.hbm %s4369_s12, %s2600_s24  ;;  %s4315_s25 = int_to_ptr.vmem [resolvable:$true] %s2371_s25 }
 0x786   : > { %s2343_s1 = scalar_lea.sflag [#allocation7], %s3675_s23  ;;  %s3206_s3 = scalar_lea.vmem %s4315_s25, 16 }
 0x787   : > { %p3207_p7 = scmp.ne.s32.totalorder %s4315_s25, %s3206_s3  ;;  %s3281_s29 = smov [#allocation6]  }
 0x788   : > { %s3210_s4 = sshll.u32 %s3281_s29, 4  ;;  %s3211_s4 = int_to_ptr.vmem [resolvable:$false] %s3210_s4 }
 0x789   : > { %p3208_p8 = pnand %p3207_p7, %p3388_p10  ;;  %s3212_s2 = scalar_lea.vmem %s3211_s4, 32 }
 0x78a   : > { %p3213_p12 = scmp.lt.s32.totalorder %s4315_s25, %s3211_s4  ;;  %p3214_p13 = scmp.lt.s32.totalorder %s3212_s2, %s3206_s3 }
 0x78b   : > { %p3209_p9 = pneg %p3208_p8 }
 0x78c   : > { %p3215_p0 = por %p3214_p13, %p3213_p12 }
 0x78e   : > { %p3216_p1 = pnand %p3215_p0, %p3209_p9 }
 0x802   : > { %v2332_v46 = vpop.xlane.xlu1 %2331 }
 0x803   : > { %3164 = vlog2.f32 %v2332_v46 }
 0x80d   : > { %v3165_v47 = vpop.eup %3164 }
 0x80e   : > { %v2334_v48 = vmul.f32 0.6931472, %v3165_v47 }
 0x810   : > { %v2335_v13 = vsub.f32 %v2327_v42, %v2334_v48 }
 0x812   : > { %2336 = vst.msk [vmem:[%s421_s14] sm:$0x1] %vm2323_vm2, %v2335_v13 }
 0x813   : > { %3219 = shalt.err (!%p3216_p1)
}
 0x814   : > { %s3220_s23 = scalar_lea.hbm %s4313_s19, 16  ;;  %s3224_s22 = scalar_lea.hbm %s4369_s12, 32 }
 0x815   : > { %p3221_p2 = scmp.ne.s32.totalorder %s4313_s19, %s3220_s23  ;;  %p3225_p5 = scmp.lt.u32.totalorder %s4313_s19, %s4369_s12 }
 0x816   : > { %p3226_p6 = scmp.lt.u32.totalorder %s3224_s22, %s3220_s23  ;;  %p3228_p8 = scmp.lt.u32.totalorder %s3220_s23, %s4313_s19 }
 0x817   : > { %p3222_p3 = pnand %p3221_p2, %p3388_p10 }
 0x818   : > { %p3227_p7 = por %p3226_p6, %p3225_p5 }
 0x819   : > { %p3223_p4 = pneg %p3222_p3 }
 0x81a   : > { %p3229_p9 = por %p3228_p8, %p3227_p7 }
 0x81c   : > { %p3230_p12 = pnand %p3229_p9, %p3223_p4 }
 0x81e   : > { %3233 = shalt.err (!%p3230_p12)
}
 0x81f   : > { %3089 = dma.vmem_to_hbm [thread:$0]  (%p3388_p10), %s4315_s25, 16, %s4313_s19, %s2343_s1  }
 0x820 PF: > { %p3099_p13 = scmp.ge.s32.totalorder %s3274_s28, 2  ;;  %s2383_s30 = sand.u32 1, %s3262_s26  }
 0x821   : > { %s2384_s15 = scalar_lea.sflag [#allocation5], %s2383_s30 }
 0x822   : > { %p3093_p0 = pnand %p3099_p13, %p3392_p11 }
 0x824   : > { %3253 = dma.done.wait (!%p3093_p0), %s2384_s15, 512  }
 0x825   : > { %3255 = vsyncadd (!%p3093_p0), %s2384_s15, 4294966784  ;;  %s2393_s3 = scalar_lea.sflag [#allocation7], %s2383_s30 }
 0x826   : > { %3257 = dma.done.wait (!%p3093_p0), %s2393_s3, 16  }
 0x827   : > { %3259 = vsyncadd (!%p3093_p0), %s2393_s3, 4294967280  ;;  %p32_p10 = scmp.ge.s32.totalorder %s3375_s13, 4   ;;  %s4380_s26 = smov %s3266_s0 }
 0x828   : > { %s4381_s0 = smov %s3270_s27  ;;  %s4382_s27 = smov %s3386_s16 }
 0x829   : > { %s4383_s28 = smov %s3375_s13  ;;  %34 = sbr.rel (!%p32_p10) target bundleno = 22 (0x16), region = 117 }
 0x830   :  { %2397 = vsyncpa [#allocation5], 1 }
 0x831   :  { %2399 = vsyncpa [#allocation5 + $0x1], 1 }
 0x832   :  { %2400 = vsyncpa [#allocation7], 1 }
 0x833   :  { %2402 = vsyncpa [#allocation7 + $0x1], 1 }

</bundles_post_ra>
